<compile_context>
chip_gen: v7x
topology: tpu7x:2x2x1
jax: 0.10.0
libtpu: 0.0.40
codegen_flags: <defaults>
</compile_context>

<pallas_src>
import math

import jax
import jax.numpy as jnp
from jax.experimental import pallas as pl
from jax.experimental.pallas import tpu as pltpu

HIDDEN = 64  # LSTM / MLP hidden width fixed by the module definition


# ------------------------------ layout helpers ------------------------------
def _round8(n):
    return ((n + 7) // 8) * 8


def _packed_layout(L, A, S):
    """Column layout of the single packed (B, padded) output buffer."""
    pieces = (("z", L), ("z_next", L), ("z_pred", L), ("a_pred", A),
              ("mdn", 3 * L), ("mdn_inv", 3 * A),
              ("s_recon", S), ("ns_recon", S), ("ns_pred", S))
    layout, off = {}, 0
    for name, w in pieces:
        layout[name] = (off, w)
        off += w
    padded = max(128, ((off + 127) // 128) * 128)
    return layout, padded


def _rec_slab_layout(L, A):
    """Row layout of the (rows, 8H) recurrence slab. All offsets 8-aligned."""
    layout, off = {}, 0
    for name, rows in (("whh", 2 * HIDDEN), ("wz", L), ("wa", A),
                       ("wzn", L), ("b", 1)):
        layout[name] = (off, rows)
        off += _round8(rows)
    return layout, _round8(off)


def _mlp_slab_layout(L, A, S):
    """Row layout / column width of the encoder/decoder/MDN slab."""
    H = HIDDEN
    cols = max(H, 3 * (L + A), S, L)
    layout, off = {}, 0
    for name, rows in (("enc_w1", S), ("enc_b1", 1), ("enc_w2", H),
                       ("enc_b2", 1), ("dec_w1", L), ("dec_b1", 1),
                       ("dec_w2", H), ("dec_b2", 1), ("mdn_w", 2 * H),
                       ("mdn_b", 1)):
        layout[name] = (off, rows)
        off += _round8(rows)
    return layout, _round8(off), cols


# --------------------------------- kernel ----------------------------------
def upn_kernel(state_ref, next_state_ref, action_ref, noise_ref,
               rec_ref, mlp_ref, out_ref):
    f32 = jnp.float32
    B, S = state_ref.shape
    A = action_ref.shape[1]
    L = noise_ref.shape[1] - A
    H = HIDDEN

    rec_layout, _ = _rec_slab_layout(L, A)
    mlp_layout, _, _ = _mlp_slab_layout(L, A, S)
    mlp_widths = {"enc_w1": H, "enc_b1": H, "enc_w2": L, "enc_b2": L,
                  "dec_w1": H, "dec_b1": H, "dec_w2": S, "dec_b2": S,
                  "mdn_w": 3 * (L + A), "mdn_b": 3 * (L + A)}

    def rec(name):
        off, rows = rec_layout[name]
        return rec_ref[off:off + rows, :]

    def mlp(name):
        off, rows = mlp_layout[name]
        return mlp_ref[off:off + rows, 0:mlp_widths[name]]

    # ------------------------------ encoder --------------------------------
    # One fused pass over (state ; next_state): (2B, S) -> (2B, L).
    x2 = jnp.concatenate([state_ref[...], next_state_ref[...]], axis=0)
    h_enc = jnp.maximum(
        jnp.dot(x2, mlp("enc_w1"), preferred_element_type=f32) + mlp("enc_b1"),
        0.0)
    z_both = jnp.dot(h_enc, mlp("enc_w2"),
                     preferred_element_type=f32) + mlp("enc_b2")
    z = z_both[0:B]
    z_next = z_both[B:2 * B]
    action = action_ref[...]

    # ---- hoisted, gate-interleaved input projections for BOTH LSTMs --------
    # gx layout per row: [i_f | i_i | f_f | f_i | g_f | g_i | o_f | o_i]
    gx = (jnp.dot(z, rec("wz"), preferred_element_type=f32)
          + jnp.dot(action, rec("wa"), preferred_element_type=f32)
          + jnp.dot(z_next, rec("wzn"), preferred_element_type=f32)
          + rec("b"))                                          # (B, 8H)

    whh = rec("whh")                                           # (2H, 8H)

    # ------------- fused fwd+inv recurrence (one matmul per step) -----------
    row_id = jax.lax.broadcasted_iota(jnp.int32, (B, 2 * H), 0)
    h_cat = jnp.zeros((1, 2 * H), f32)       # [h_f | h_i]
    c_cat = jnp.zeros((1, 2 * H), f32)       # [c_f | c_i]
    hs = jnp.zeros((B, 2 * H), f32)          # collected hidden states

    for t in range(B):  # B static -> fully unrolled
        gates = gx[t:t + 1, :] + jnp.dot(h_cat, whh,
                                         preferred_element_type=f32)
        i_g = jax.nn.sigmoid(gates[:, 0:2 * H])
        f_g = jax.nn.sigmoid(gates[:, 2 * H:4 * H])
        g_g = jnp.tanh(gates[:, 4 * H:6 * H])
        o_g = jax.nn.sigmoid(gates[:, 6 * H:8 * H])
        c_cat = f_g * c_cat + i_g * g_g
        h_cat = o_g * jnp.tanh(c_cat)
        hs = jnp.where(row_id == t, jnp.broadcast_to(h_cat, (B, 2 * H)), hs)

    # ----------------------- fused MDN heads (one matmul) -------------------
    mdn_cat = jnp.dot(hs, mlp("mdn_w"),
                      preferred_element_type=f32) + mlp("mdn_b")   # (B, 3L+3A)
    noise = noise_ref[...]
    z_pred = mdn_cat[:, 0:L] + jnp.exp(mdn_cat[:, L:2 * L]) * noise[:, 0:L]
    a_pred = (mdn_cat[:, 3 * L:3 * L + A]
              + jnp.exp(mdn_cat[:, 3 * L + A:3 * L + 2 * A]) * noise[:, L:L + A])

    # --------------------- decoder, one pass on (3B, L) ---------------------
    dec_in = jnp.concatenate([z_both, z_pred], axis=0)          # (3B, L)
    h_dec = jnp.maximum(
        jnp.dot(dec_in, mlp("dec_w1"), preferred_element_type=f32) + mlp("dec_b1"),
        0.0)
    recon = jnp.dot(h_dec, mlp("dec_w2"),
                    preferred_element_type=f32) + mlp("dec_b2")  # (3B, S)

    # ---------- assemble packed row in registers, single full store ---------
    pieces = [z, z_next, z_pred, a_pred, mdn_cat,
              recon[0:B], recon[B:2 * B], recon[2 * B:3 * B]]
    used = sum(p.shape[-1] for p in pieces)
    pad = out_ref.shape[1] - used
    if pad > 0:
        pieces.append(jnp.zeros((B, pad), f32))
    out_ref[...] = jnp.concatenate(pieces, axis=-1)


# -------------------------------- wrapper -----------------------------------
def upn_forward(packed, state, action, next_state, noise):
    """packed: dict from pack_params (built once). noise: (B, L+A)."""
    B, S = state.shape
    A = action.shape[1]
    L = noise.shape[1] - A

    layout, padded = _packed_layout(L, A, S)
    vmem = pl.BlockSpec(memory_space=pltpu.MemorySpace.VMEM)

    out = pl.pallas_call(
        upn_kernel,
        out_shape=jax.ShapeDtypeStruct((B, padded), jnp.float32),
        in_specs=[vmem] * 6,
        out_specs=vmem,
    )(state, next_state, action, noise, packed["rec"], packed["mlp"])

    def sl(name):
        off, w = layout[name]
        return out[:, off:off + w]

    return (sl("z"), sl("z_next"), sl("z_pred"), sl("a_pred"),
            sl("mdn"), sl("mdn_inv"),
            sl("s_recon"), sl("ns_recon"), sl("ns_pred"))


# ---------------------- deterministic parameter init ------------------------
def init_params(key, state_dim, action_dim, latent_dim):
    H = HIDDEN

    def lin(k, fan_in, fan_out):
        k1, k2 = jax.random.split(k)
        bound = 1.0 / math.sqrt(fan_in)
        w = jax.random.uniform(k1, (fan_in, fan_out), jnp.float32, -bound, bound)
        b = jax.random.uniform(k2, (1, fan_out), jnp.float32, -bound, bound)
        return w, b

    def lstm(k, in_dim):
        k1, k2, k3, k4 = jax.random.split(k, 4)
        bound = 1.0 / math.sqrt(H)
        wih = jax.random.uniform(k1, (in_dim, 4 * H), jnp.float32, -bound, bound)
        whh = jax.random.uniform(k2, (H, 4 * H), jnp.float32, -bound, bound)
        bih = jax.random.uniform(k3, (1, 4 * H), jnp.float32, -bound, bound)
        bhh = jax.random.uniform(k4, (1, 4 * H), jnp.float32, -bound, bound)
        return wih, whh, bih + bhh   # biases always summed -> fold together

    ks = jax.random.split(key, 10)
    p = {}
    p["enc_w1"], p["enc_b1"] = lin(ks[0], state_dim, H)
    p["enc_w2"], p["enc_b2"] = lin(ks[1], H, latent_dim)
    p["dec_w1"], p["dec_b1"] = lin(ks[2], latent_dim, H)
    p["dec_w2"], p["dec_b2"] = lin(ks[3], H, state_dim)
    p["f_wih"], p["f_whh"], p["f_b"] = lstm(ks[4], latent_dim + action_dim)
    p["f_mdn_w"], p["f_mdn_b"] = lin(ks[5], H, 3 * latent_dim)
    p["i_wih"], p["i_whh"], p["i_b"] = lstm(ks[6], 2 * latent_dim)
    p["i_mdn_w"], p["i_mdn_b"] = lin(ks[7], H, 3 * action_dim)
    return p


# -------------------- one-time packing into two dense slabs ------------------
def pack_params(p):
    """Build the two lane-dense kernel slabs. Call ONCE, outside the hot path."""
    H = HIDDEN
    f32 = jnp.float32
    L = p["enc_w2"].shape[1]
    S = p["enc_w1"].shape[0]
    A = p["i_mdn_w"].shape[1] // 3

    def gate_interleave(cf, ci):
        # cf, ci: (r, 4H) with PyTorch gate order (i,f,g,o) on columns.
        # Returns (r, 8H) laid out [i_f|i_i|f_f|f_i|g_f|g_i|o_f|o_i].
        parts = []
        for g in range(4):
            parts.append(cf[:, g * H:(g + 1) * H])
            parts.append(ci[:, g * H:(g + 1) * H])
        return jnp.concatenate(parts, axis=1)

    # --- recurrence slab (rows, 8H) ---
    rec_layout, rec_rows = _rec_slab_layout(L, A)
    z4 = jnp.zeros((H, 4 * H), f32)
    whh_big = jnp.concatenate(
        [gate_interleave(p["f_whh"], z4),        # rows 0:H   <- h_f
         gate_interleave(z4, p["i_whh"])],       # rows H:2H  <- h_i
        axis=0)
    wz_big = gate_interleave(p["f_wih"][:L], p["i_wih"][:L])     # z feeds both
    wa_big = gate_interleave(p["f_wih"][L:], jnp.zeros((A, 4 * H), f32))
    wzn_big = gate_interleave(jnp.zeros((L, 4 * H), f32), p["i_wih"][L:])
    b_big = gate_interleave(p["f_b"], p["i_b"])

    slab_rec = jnp.zeros((rec_rows, 8 * H), f32)
    for name, arr in (("whh", whh_big), ("wz", wz_big), ("wa", wa_big),
                      ("wzn", wzn_big), ("b", b_big)):
        off, rows = rec_layout[name]
        slab_rec = slab_rec.at[off:off + rows, :].set(arr)

    # --- encoder / decoder / MDN slab (rows, cols) ---
    mlp_layout, mlp_rows, mlp_cols = _mlp_slab_layout(L, A, S)
    mdn_w_big = jnp.concatenate(
        [jnp.concatenate([p["f_mdn_w"], jnp.zeros((H, 3 * A), f32)], axis=1),
         jnp.concatenate([jnp.zeros((H, 3 * L), f32), p["i_mdn_w"]], axis=1)],
        axis=0)                                                  # (2H, 3L+3A)
    mdn_b_big = jnp.concatenate([p["f_mdn_b"], p["i_mdn_b"]], axis=1)

    slab_mlp = jnp.zeros((mlp_rows, mlp_cols), f32)
    for name, arr in (("enc_w1", p["enc_w1"]), ("enc_b1", p["enc_b1"]),
                      ("enc_w2", p["enc_w2"]), ("enc_b2", p["enc_b2"]),
                      ("dec_w1", p["dec_w1"]), ("dec_b1", p["dec_b1"]),
                      ("dec_w2", p["dec_w2"]), ("dec_b2", p["dec_b2"]),
                      ("mdn_w", mdn_w_big), ("mdn_b", mdn_b_big)):
        off, rows = mlp_layout[name]
        slab_mlp = slab_mlp.at[off:off + rows, 0:arr.shape[1]].set(arr)

    return {"rec": slab_rec, "mlp": slab_mlp}


# --------------------------- pure-JAX reference -----------------------------
def upn_reference(p, state, action, next_state, noise_z, noise_a):
    H = HIDDEN
    L = p["enc_w2"].shape[1]
    A = action.shape[1]

    def mlp2(x, w1, b1, w2, b2):
        return jnp.maximum(x @ w1 + b1, 0.0) @ w2 + b2

    def lstm(x_seq, wih, whh, b):
        def step(carry, x_t):
            h, c = carry
            gates = x_t @ wih + h @ whh + b[0]
            i = jax.nn.sigmoid(gates[0:H])
            f = jax.nn.sigmoid(gates[H:2 * H])
            g = jnp.tanh(gates[2 * H:3 * H])
            o = jax.nn.sigmoid(gates[3 * H:4 * H])
            c = f * c + i * g
            h = o * jnp.tanh(c)
            return (h, c), h
        _, hs = jax.lax.scan(step, (jnp.zeros(H), jnp.zeros(H)), x_seq)
        return hs

    z = mlp2(state, p["enc_w1"], p["enc_b1"], p["enc_w2"], p["enc_b2"])
    z_next = mlp2(next_state, p["enc_w1"], p["enc_b1"], p["enc_w2"], p["enc_b2"])
    h = lstm(jnp.concatenate([z, action], -1), p["f_wih"], p["f_whh"], p["f_b"])
    mdn = h @ p["f_mdn_w"] + p["f_mdn_b"]
    z_pred = mdn[:, :L] + jnp.exp(mdn[:, L:2 * L]) * noise_z
    h_inv = lstm(jnp.concatenate([z, z_next], -1), p["i_wih"], p["i_whh"], p["i_b"])
    mdn_inv = h_inv @ p["i_mdn_w"] + p["i_mdn_b"]
    a_pred = mdn_inv[:, :A] + jnp.exp(mdn_inv[:, A:2 * A]) * noise_a
    s_recon = mlp2(z, p["dec_w1"], p["dec_b1"], p["dec_w2"], p["dec_b2"])
    ns_recon = mlp2(z_next, p["dec_w1"], p["dec_b1"], p["dec_w2"], p["dec_b2"])
    ns_pred = mlp2(z_pred, p["dec_w1"], p["dec_b1"], p["dec_w2"], p["dec_b2"])
    return (z, z_next, z_pred, a_pred, mdn, mdn_inv, s_recon, ns_recon, ns_pred)


# --------------------------------- main --------------------------------------
if __name__ == "__main__":
    B, STATE_DIM, ACTION_DIM, LATENT_DIM = 8, 16, 4, 8

    key = jax.random.PRNGKey(0)
    kp, ks, ka, kn, kz = jax.random.split(key, 5)
    params = init_params(kp, STATE_DIM, ACTION_DIM, LATENT_DIM)
    packed = pack_params(params)        # one-time packing, outside hot path

    state = jax.random.normal(ks, (B, STATE_DIM), jnp.float32)
    action = jax.random.normal(ka, (B, ACTION_DIM), jnp.float32)
    next_state = jax.random.normal(kn, (B, STATE_DIM), jnp.float32)
    # deterministic stand-in for torch.randn_like in sample_mdn
    noise = jax.random.normal(kz, (B, LATENT_DIM + ACTION_DIM), jnp.float32)
    noise_z, noise_a = noise[:, :LATENT_DIM], noise[:, LATENT_DIM:]

    outs = jax.jit(upn_forward)(packed, state, action, next_state, noise)
    outs = jax.block_until_ready(outs)

    refs = upn_reference(params, state, action, next_state, noise_z, noise_a)
    names = ["z", "z_next", "z_pred", "action_pred", "mdn_output",
             "mdn_output_inv", "state_recon", "next_state_recon",
             "next_state_pred"]
    for name, o, r in zip(names, outs, refs):
        assert o.shape == r.shape, (name, o.shape, r.shape)
        assert jnp.allclose(o, r, rtol=1e-2, atol=1e-2), name

    print("KERNEL_OK")
</pallas_src>

<mosaic_0001>
module attributes {stable_mosaic.version = 11 : i64} {
  func.func @upn_kernel(%arg0: memref<8x16xf32, #tpu.memory_space<vmem>>, %arg1: memref<8x16xf32, #tpu.memory_space<vmem>>, %arg2: memref<8x4xf32, #tpu.memory_space<vmem>>, %arg3: memref<8x12xf32, #tpu.memory_space<vmem>>, %arg4: memref<160x512xf32, #tpu.memory_space<vmem>>, %arg5: memref<320x64xf32, #tpu.memory_space<vmem>>, %arg6: memref<8x128xf32, #tpu.memory_space<vmem>>) attributes {dimension_semantics = [], scalar_prefetch = 0 : i64, scratch_operands = 0 : i64, tpu.core_type = #tpu.core_type<tc>} {
    %c0 = arith.constant 0 : index
    %c0_0 = arith.constant 0 : index
    %0 = vector.load %arg0[%c0, %c0_0] : memref<8x16xf32, #tpu.memory_space<vmem>>, vector<8x16xf32>
    %c0_1 = arith.constant 0 : index
    %c0_2 = arith.constant 0 : index
    %1 = vector.load %arg1[%c0_1, %c0_2] : memref<8x16xf32, #tpu.memory_space<vmem>>, vector<8x16xf32>
    %2 = tpu.concatenate %0, %1 in 0 : vector<8x16xf32>, vector<8x16xf32> -> vector<16x16xf32>
    %c0_3 = arith.constant 0 : index
    %c0_4 = arith.constant 0 : index
    %3 = vector.load %arg5[%c0_3, %c0_4] : memref<320x64xf32, #tpu.memory_space<vmem>>, vector<16x64xf32>
    %cst = arith.constant dense<0.000000e+00> : vector<16x64xf32>
    %4 = tpu.matmul %2, %3, %cst {dimension_numbers = #tpu.dot_dimension_numbers<[1], [0], [0], [1], [0, 0, 1, 1], [], []>} : vector<16x16xf32>, vector<16x64xf32>, vector<16x64xf32> -> vector<16x64xf32>
    %c16 = arith.constant 16 : index
    %c0_5 = arith.constant 0 : index
    %5 = vector.load %arg5[%c16, %c0_5] : memref<320x64xf32, #tpu.memory_space<vmem>>, vector<1x64xf32>
    %6 = vector.broadcast %5 : vector<1x64xf32> to vector<16x64xf32>
    %7 = arith.addf %4, %6 : vector<16x64xf32>
    %cst_6 = arith.constant 0.000000e+00 : f32
    %8 = vector.broadcast %cst_6 : f32 to vector<16x64xf32>
    %9 = arith.maximumf %7, %8 : vector<16x64xf32>
    %c24 = arith.constant 24 : index
    %c0_7 = arith.constant 0 : index
    %10 = vector.load %arg5[%c24, %c0_7] : memref<320x64xf32, #tpu.memory_space<vmem>>, vector<64x8xf32>
    %cst_8 = arith.constant dense<0.000000e+00> : vector<16x8xf32>
    %11 = tpu.matmul %9, %10, %cst_8 {dimension_numbers = #tpu.dot_dimension_numbers<[1], [0], [0], [1], [0, 0, 1, 1], [], []>} : vector<16x64xf32>, vector<64x8xf32>, vector<16x8xf32> -> vector<16x8xf32>
    %c88 = arith.constant 88 : index
    %c0_9 = arith.constant 0 : index
    %12 = vector.load %arg5[%c88, %c0_9] : memref<320x64xf32, #tpu.memory_space<vmem>>, vector<1x8xf32>
    %13 = vector.broadcast %12 : vector<1x8xf32> to vector<16x8xf32>
    %14 = arith.addf %11, %13 : vector<16x8xf32>
    %15 = vector.extract_strided_slice %14 {offsets = [0, 0], sizes = [8, 8], strides = [1, 1]} : vector<16x8xf32> to vector<8x8xf32>
    %16 = vector.extract_strided_slice %14 {offsets = [8, 0], sizes = [8, 8], strides = [1, 1]} : vector<16x8xf32> to vector<8x8xf32>
    %c0_10 = arith.constant 0 : index
    %c0_11 = arith.constant 0 : index
    %17 = vector.load %arg2[%c0_10, %c0_11] : memref<8x4xf32, #tpu.memory_space<vmem>>, vector<8x4xf32>
    %c128 = arith.constant 128 : index
    %c0_12 = arith.constant 0 : index
    %18 = vector.load %arg4[%c128, %c0_12] : memref<160x512xf32, #tpu.memory_space<vmem>>, vector<8x512xf32>
    %cst_13 = arith.constant dense<0.000000e+00> : vector<8x512xf32>
    %19 = tpu.matmul %15, %18, %cst_13 {dimension_numbers = #tpu.dot_dimension_numbers<[1], [0], [0], [1], [0, 0, 1, 1], [], []>} : vector<8x8xf32>, vector<8x512xf32>, vector<8x512xf32> -> vector<8x512xf32>
    %c136 = arith.constant 136 : index
    %c0_14 = arith.constant 0 : index
    %20 = vector.load %arg4[%c136, %c0_14] : memref<160x512xf32, #tpu.memory_space<vmem>>, vector<4x512xf32>
    %cst_15 = arith.constant dense<0.000000e+00> : vector<8x512xf32>
    %21 = tpu.matmul %17, %20, %cst_15 {dimension_numbers = #tpu.dot_dimension_numbers<[1], [0], [0], [1], [0, 0, 1, 1], [], []>} : vector<8x4xf32>, vector<4x512xf32>, vector<8x512xf32> -> vector<8x512xf32>
    %22 = arith.addf %19, %21 : vector<8x512xf32>
    %c144 = arith.constant 144 : index
    %c0_16 = arith.constant 0 : index
    %23 = vector.load %arg4[%c144, %c0_16] : memref<160x512xf32, #tpu.memory_space<vmem>>, vector<8x512xf32>
    %cst_17 = arith.constant dense<0.000000e+00> : vector<8x512xf32>
    %24 = tpu.matmul %16, %23, %cst_17 {dimension_numbers = #tpu.dot_dimension_numbers<[1], [0], [0], [1], [0, 0, 1, 1], [], []>} : vector<8x8xf32>, vector<8x512xf32>, vector<8x512xf32> -> vector<8x512xf32>
    %25 = arith.addf %22, %24 : vector<8x512xf32>
    %c152 = arith.constant 152 : index
    %c0_18 = arith.constant 0 : index
    %26 = vector.load %arg4[%c152, %c0_18] : memref<160x512xf32, #tpu.memory_space<vmem>>, vector<1x512xf32>
    %27 = vector.broadcast %26 : vector<1x512xf32> to vector<8x512xf32>
    %28 = arith.addf %25, %27 : vector<8x512xf32>
    %c0_19 = arith.constant 0 : index
    %c0_20 = arith.constant 0 : index
    %29 = vector.load %arg4[%c0_19, %c0_20] : memref<160x512xf32, #tpu.memory_space<vmem>>, vector<128x512xf32>
    %30 = tpu.iota {dimensions = array<i32: 0>} : vector<8x128xi32>
    %cst_21 = arith.constant 0.000000e+00 : f32
    %31 = vector.broadcast %cst_21 : f32 to vector<1x128xf32>
    %cst_22 = arith.constant 0.000000e+00 : f32
    %32 = vector.broadcast %cst_22 : f32 to vector<1x128xf32>
    %cst_23 = arith.constant 0.000000e+00 : f32
    %33 = vector.broadcast %cst_23 : f32 to vector<8x128xf32>
    %34 = vector.extract_strided_slice %28 {offsets = [0, 0], sizes = [1, 512], strides = [1, 1]} : vector<8x512xf32> to vector<1x512xf32>
    %cst_24 = arith.constant dense<0.000000e+00> : vector<1x512xf32>
    %35 = tpu.matmul %31, %29, %cst_24 {dimension_numbers = #tpu.dot_dimension_numbers<[1], [0], [0], [1], [0, 0, 1, 1], [], []>} : vector<1x128xf32>, vector<128x512xf32>, vector<1x512xf32> -> vector<1x512xf32>
    %36 = arith.addf %34, %35 : vector<1x512xf32>
    %37 = vector.extract_strided_slice %36 {offsets = [0, 0], sizes = [1, 128], strides = [1, 1]} : vector<1x512xf32> to vector<1x128xf32>
    %38 = arith.negf %37 : vector<1x128xf32>
    %39 = math.exp %38 : vector<1x128xf32>
    %cst_25 = arith.constant 1.000000e+00 : f32
    %40 = vector.broadcast %cst_25 : f32 to vector<1x128xf32>
    %41 = arith.addf %40, %39 : vector<1x128xf32>
    %42 = arith.divf %40, %41 : vector<1x128xf32>
    %43 = vector.extract_strided_slice %36 {offsets = [0, 128], sizes = [1, 128], strides = [1, 1]} : vector<1x512xf32> to vector<1x128xf32>
    %44 = arith.negf %43 : vector<1x128xf32>
    %45 = math.exp %44 : vector<1x128xf32>
    %cst_26 = arith.constant 1.000000e+00 : f32
    %46 = vector.broadcast %cst_26 : f32 to vector<1x128xf32>
    %47 = arith.addf %46, %45 : vector<1x128xf32>
    %48 = arith.divf %46, %47 : vector<1x128xf32>
    %49 = vector.extract_strided_slice %36 {offsets = [0, 256], sizes = [1, 128], strides = [1, 1]} : vector<1x512xf32> to vector<1x128xf32>
    %50 = math.tanh %49 : vector<1x128xf32>
    %51 = vector.extract_strided_slice %36 {offsets = [0, 384], sizes = [1, 128], strides = [1, 1]} : vector<1x512xf32> to vector<1x128xf32>
    %52 = arith.negf %51 : vector<1x128xf32>
    %53 = math.exp %52 : vector<1x128xf32>
    %cst_27 = arith.constant 1.000000e+00 : f32
    %54 = vector.broadcast %cst_27 : f32 to vector<1x128xf32>
    %55 = arith.addf %54, %53 : vector<1x128xf32>
    %56 = arith.divf %54, %55 : vector<1x128xf32>
    %57 = arith.mulf %48, %32 : vector<1x128xf32>
    %58 = arith.mulf %42, %50 : vector<1x128xf32>
    %59 = arith.addf %57, %58 : vector<1x128xf32>
    %60 = math.tanh %59 : vector<1x128xf32>
    %61 = arith.mulf %56, %60 : vector<1x128xf32>
    %c0_i32 = arith.constant 0 : i32
    %62 = vector.broadcast %c0_i32 : i32 to vector<8x128xi32>
    %63 = arith.cmpi eq, %30, %62 : vector<8x128xi32>
    %64 = vector.shape_cast %61 : vector<1x128xf32> to vector<1x128xf32>
    %65 = vector.broadcast %64 : vector<1x128xf32> to vector<8x128xf32>
    %66 = arith.select %63, %65, %33 : vector<8x128xi1>, vector<8x128xf32>
    %67 = vector.extract_strided_slice %28 {offsets = [1, 0], sizes = [1, 512], strides = [1, 1]} : vector<8x512xf32> to vector<1x512xf32>
    %cst_28 = arith.constant dense<0.000000e+00> : vector<1x512xf32>
    %68 = tpu.matmul %61, %29, %cst_28 {dimension_numbers = #tpu.dot_dimension_numbers<[1], [0], [0], [1], [0, 0, 1, 1], [], []>} : vector<1x128xf32>, vector<128x512xf32>, vector<1x512xf32> -> vector<1x512xf32>
    %69 = arith.addf %67, %68 : vector<1x512xf32>
    %70 = vector.extract_strided_slice %69 {offsets = [0, 0], sizes = [1, 128], strides = [1, 1]} : vector<1x512xf32> to vector<1x128xf32>
    %71 = arith.negf %70 : vector<1x128xf32>
    %72 = math.exp %71 : vector<1x128xf32>
    %cst_29 = arith.constant 1.000000e+00 : f32
    %73 = vector.broadcast %cst_29 : f32 to vector<1x128xf32>
    %74 = arith.addf %73, %72 : vector<1x128xf32>
    %75 = arith.divf %73, %74 : vector<1x128xf32>
    %76 = vector.extract_strided_slice %69 {offsets = [0, 128], sizes = [1, 128], strides = [1, 1]} : vector<1x512xf32> to vector<1x128xf32>
    %77 = arith.negf %76 : vector<1x128xf32>
    %78 = math.exp %77 : vector<1x128xf32>
    %cst_30 = arith.constant 1.000000e+00 : f32
    %79 = vector.broadcast %cst_30 : f32 to vector<1x128xf32>
    %80 = arith.addf %79, %78 : vector<1x128xf32>
    %81 = arith.divf %79, %80 : vector<1x128xf32>
    %82 = vector.extract_strided_slice %69 {offsets = [0, 256], sizes = [1, 128], strides = [1, 1]} : vector<1x512xf32> to vector<1x128xf32>
    %83 = math.tanh %82 : vector<1x128xf32>
    %84 = vector.extract_strided_slice %69 {offsets = [0, 384], sizes = [1, 128], strides = [1, 1]} : vector<1x512xf32> to vector<1x128xf32>
    %85 = arith.negf %84 : vector<1x128xf32>
    %86 = math.exp %85 : vector<1x128xf32>
    %cst_31 = arith.constant 1.000000e+00 : f32
    %87 = vector.broadcast %cst_31 : f32 to vector<1x128xf32>
    %88 = arith.addf %87, %86 : vector<1x128xf32>
    %89 = arith.divf %87, %88 : vector<1x128xf32>
    %90 = arith.mulf %81, %59 : vector<1x128xf32>
    %91 = arith.mulf %75, %83 : vector<1x128xf32>
    %92 = arith.addf %90, %91 : vector<1x128xf32>
    %93 = math.tanh %92 : vector<1x128xf32>
    %94 = arith.mulf %89, %93 : vector<1x128xf32>
    %c1_i32 = arith.constant 1 : i32
    %95 = vector.broadcast %c1_i32 : i32 to vector<8x128xi32>
    %96 = arith.cmpi eq, %30, %95 : vector<8x128xi32>
    %97 = vector.shape_cast %94 : vector<1x128xf32> to vector<1x128xf32>
    %98 = vector.broadcast %97 : vector<1x128xf32> to vector<8x128xf32>
    %99 = arith.select %96, %98, %66 : vector<8x128xi1>, vector<8x128xf32>
    %100 = vector.extract_strided_slice %28 {offsets = [2, 0], sizes = [1, 512], strides = [1, 1]} : vector<8x512xf32> to vector<1x512xf32>
    %cst_32 = arith.constant dense<0.000000e+00> : vector<1x512xf32>
    %101 = tpu.matmul %94, %29, %cst_32 {dimension_numbers = #tpu.dot_dimension_numbers<[1], [0], [0], [1], [0, 0, 1, 1], [], []>} : vector<1x128xf32>, vector<128x512xf32>, vector<1x512xf32> -> vector<1x512xf32>
    %102 = arith.addf %100, %101 : vector<1x512xf32>
    %103 = vector.extract_strided_slice %102 {offsets = [0, 0], sizes = [1, 128], strides = [1, 1]} : vector<1x512xf32> to vector<1x128xf32>
    %104 = arith.negf %103 : vector<1x128xf32>
    %105 = math.exp %104 : vector<1x128xf32>
    %cst_33 = arith.constant 1.000000e+00 : f32
    %106 = vector.broadcast %cst_33 : f32 to vector<1x128xf32>
    %107 = arith.addf %106, %105 : vector<1x128xf32>
    %108 = arith.divf %106, %107 : vector<1x128xf32>
    %109 = vector.extract_strided_slice %102 {offsets = [0, 128], sizes = [1, 128], strides = [1, 1]} : vector<1x512xf32> to vector<1x128xf32>
    %110 = arith.negf %109 : vector<1x128xf32>
    %111 = math.exp %110 : vector<1x128xf32>
    %cst_34 = arith.constant 1.000000e+00 : f32
    %112 = vector.broadcast %cst_34 : f32 to vector<1x128xf32>
    %113 = arith.addf %112, %111 : vector<1x128xf32>
    %114 = arith.divf %112, %113 : vector<1x128xf32>
    %115 = vector.extract_strided_slice %102 {offsets = [0, 256], sizes = [1, 128], strides = [1, 1]} : vector<1x512xf32> to vector<1x128xf32>
    %116 = math.tanh %115 : vector<1x128xf32>
    %117 = vector.extract_strided_slice %102 {offsets = [0, 384], sizes = [1, 128], strides = [1, 1]} : vector<1x512xf32> to vector<1x128xf32>
    %118 = arith.negf %117 : vector<1x128xf32>
    %119 = math.exp %118 : vector<1x128xf32>
    %cst_35 = arith.constant 1.000000e+00 : f32
    %120 = vector.broadcast %cst_35 : f32 to vector<1x128xf32>
    %121 = arith.addf %120, %119 : vector<1x128xf32>
    %122 = arith.divf %120, %121 : vector<1x128xf32>
    %123 = arith.mulf %114, %92 : vector<1x128xf32>
    %124 = arith.mulf %108, %116 : vector<1x128xf32>
    %125 = arith.addf %123, %124 : vector<1x128xf32>
    %126 = math.tanh %125 : vector<1x128xf32>
    %127 = arith.mulf %122, %126 : vector<1x128xf32>
    %c2_i32 = arith.constant 2 : i32
    %128 = vector.broadcast %c2_i32 : i32 to vector<8x128xi32>
    %129 = arith.cmpi eq, %30, %128 : vector<8x128xi32>
    %130 = vector.shape_cast %127 : vector<1x128xf32> to vector<1x128xf32>
    %131 = vector.broadcast %130 : vector<1x128xf32> to vector<8x128xf32>
    %132 = arith.select %129, %131, %99 : vector<8x128xi1>, vector<8x128xf32>
    %133 = vector.extract_strided_slice %28 {offsets = [3, 0], sizes = [1, 512], strides = [1, 1]} : vector<8x512xf32> to vector<1x512xf32>
    %cst_36 = arith.constant dense<0.000000e+00> : vector<1x512xf32>
    %134 = tpu.matmul %127, %29, %cst_36 {dimension_numbers = #tpu.dot_dimension_numbers<[1], [0], [0], [1], [0, 0, 1, 1], [], []>} : vector<1x128xf32>, vector<128x512xf32>, vector<1x512xf32> -> vector<1x512xf32>
    %135 = arith.addf %133, %134 : vector<1x512xf32>
    %136 = vector.extract_strided_slice %135 {offsets = [0, 0], sizes = [1, 128], strides = [1, 1]} : vector<1x512xf32> to vector<1x128xf32>
    %137 = arith.negf %136 : vector<1x128xf32>
    %138 = math.exp %137 : vector<1x128xf32>
    %cst_37 = arith.constant 1.000000e+00 : f32
    %139 = vector.broadcast %cst_37 : f32 to vector<1x128xf32>
    %140 = arith.addf %139, %138 : vector<1x128xf32>
    %141 = arith.divf %139, %140 : vector<1x128xf32>
    %142 = vector.extract_strided_slice %135 {offsets = [0, 128], sizes = [1, 128], strides = [1, 1]} : vector<1x512xf32> to vector<1x128xf32>
    %143 = arith.negf %142 : vector<1x128xf32>
    %144 = math.exp %143 : vector<1x128xf32>
    %cst_38 = arith.constant 1.000000e+00 : f32
    %145 = vector.broadcast %cst_38 : f32 to vector<1x128xf32>
    %146 = arith.addf %145, %144 : vector<1x128xf32>
    %147 = arith.divf %145, %146 : vector<1x128xf32>
    %148 = vector.extract_strided_slice %135 {offsets = [0, 256], sizes = [1, 128], strides = [1, 1]} : vector<1x512xf32> to vector<1x128xf32>
    %149 = math.tanh %148 : vector<1x128xf32>
    %150 = vector.extract_strided_slice %135 {offsets = [0, 384], sizes = [1, 128], strides = [1, 1]} : vector<1x512xf32> to vector<1x128xf32>
    %151 = arith.negf %150 : vector<1x128xf32>
    %152 = math.exp %151 : vector<1x128xf32>
    %cst_39 = arith.constant 1.000000e+00 : f32
    %153 = vector.broadcast %cst_39 : f32 to vector<1x128xf32>
    %154 = arith.addf %153, %152 : vector<1x128xf32>
    %155 = arith.divf %153, %154 : vector<1x128xf32>
    %156 = arith.mulf %147, %125 : vector<1x128xf32>
    %157 = arith.mulf %141, %149 : vector<1x128xf32>
    %158 = arith.addf %156, %157 : vector<1x128xf32>
    %159 = math.tanh %158 : vector<1x128xf32>
    %160 = arith.mulf %155, %159 : vector<1x128xf32>
    %c3_i32 = arith.constant 3 : i32
    %161 = vector.broadcast %c3_i32 : i32 to vector<8x128xi32>
    %162 = arith.cmpi eq, %30, %161 : vector<8x128xi32>
    %163 = vector.shape_cast %160 : vector<1x128xf32> to vector<1x128xf32>
    %164 = vector.broadcast %163 : vector<1x128xf32> to vector<8x128xf32>
    %165 = arith.select %162, %164, %132 : vector<8x128xi1>, vector<8x128xf32>
    %166 = vector.extract_strided_slice %28 {offsets = [4, 0], sizes = [1, 512], strides = [1, 1]} : vector<8x512xf32> to vector<1x512xf32>
    %cst_40 = arith.constant dense<0.000000e+00> : vector<1x512xf32>
    %167 = tpu.matmul %160, %29, %cst_40 {dimension_numbers = #tpu.dot_dimension_numbers<[1], [0], [0], [1], [0, 0, 1, 1], [], []>} : vector<1x128xf32>, vector<128x512xf32>, vector<1x512xf32> -> vector<1x512xf32>
    %168 = arith.addf %166, %167 : vector<1x512xf32>
    %169 = vector.extract_strided_slice %168 {offsets = [0, 0], sizes = [1, 128], strides = [1, 1]} : vector<1x512xf32> to vector<1x128xf32>
    %170 = arith.negf %169 : vector<1x128xf32>
    %171 = math.exp %170 : vector<1x128xf32>
    %cst_41 = arith.constant 1.000000e+00 : f32
    %172 = vector.broadcast %cst_41 : f32 to vector<1x128xf32>
    %173 = arith.addf %172, %171 : vector<1x128xf32>
    %174 = arith.divf %172, %173 : vector<1x128xf32>
    %175 = vector.extract_strided_slice %168 {offsets = [0, 128], sizes = [1, 128], strides = [1, 1]} : vector<1x512xf32> to vector<1x128xf32>
    %176 = arith.negf %175 : vector<1x128xf32>
    %177 = math.exp %176 : vector<1x128xf32>
    %cst_42 = arith.constant 1.000000e+00 : f32
    %178 = vector.broadcast %cst_42 : f32 to vector<1x128xf32>
    %179 = arith.addf %178, %177 : vector<1x128xf32>
    %180 = arith.divf %178, %179 : vector<1x128xf32>
    %181 = vector.extract_strided_slice %168 {offsets = [0, 256], sizes = [1, 128], strides = [1, 1]} : vector<1x512xf32> to vector<1x128xf32>
    %182 = math.tanh %181 : vector<1x128xf32>
    %183 = vector.extract_strided_slice %168 {offsets = [0, 384], sizes = [1, 128], strides = [1, 1]} : vector<1x512xf32> to vector<1x128xf32>
    %184 = arith.negf %183 : vector<1x128xf32>
    %185 = math.exp %184 : vector<1x128xf32>
    %cst_43 = arith.constant 1.000000e+00 : f32
    %186 = vector.broadcast %cst_43 : f32 to vector<1x128xf32>
    %187 = arith.addf %186, %185 : vector<1x128xf32>
    %188 = arith.divf %186, %187 : vector<1x128xf32>
    %189 = arith.mulf %180, %158 : vector<1x128xf32>
    %190 = arith.mulf %174, %182 : vector<1x128xf32>
    %191 = arith.addf %189, %190 : vector<1x128xf32>
    %192 = math.tanh %191 : vector<1x128xf32>
    %193 = arith.mulf %188, %192 : vector<1x128xf32>
    %c4_i32 = arith.constant 4 : i32
    %194 = vector.broadcast %c4_i32 : i32 to vector<8x128xi32>
    %195 = arith.cmpi eq, %30, %194 : vector<8x128xi32>
    %196 = vector.shape_cast %193 : vector<1x128xf32> to vector<1x128xf32>
    %197 = vector.broadcast %196 : vector<1x128xf32> to vector<8x128xf32>
    %198 = arith.select %195, %197, %165 : vector<8x128xi1>, vector<8x128xf32>
    %199 = vector.extract_strided_slice %28 {offsets = [5, 0], sizes = [1, 512], strides = [1, 1]} : vector<8x512xf32> to vector<1x512xf32>
    %cst_44 = arith.constant dense<0.000000e+00> : vector<1x512xf32>
    %200 = tpu.matmul %193, %29, %cst_44 {dimension_numbers = #tpu.dot_dimension_numbers<[1], [0], [0], [1], [0, 0, 1, 1], [], []>} : vector<1x128xf32>, vector<128x512xf32>, vector<1x512xf32> -> vector<1x512xf32>
    %201 = arith.addf %199, %200 : vector<1x512xf32>
    %202 = vector.extract_strided_slice %201 {offsets = [0, 0], sizes = [1, 128], strides = [1, 1]} : vector<1x512xf32> to vector<1x128xf32>
    %203 = arith.negf %202 : vector<1x128xf32>
    %204 = math.exp %203 : vector<1x128xf32>
    %cst_45 = arith.constant 1.000000e+00 : f32
    %205 = vector.broadcast %cst_45 : f32 to vector<1x128xf32>
    %206 = arith.addf %205, %204 : vector<1x128xf32>
    %207 = arith.divf %205, %206 : vector<1x128xf32>
    %208 = vector.extract_strided_slice %201 {offsets = [0, 128], sizes = [1, 128], strides = [1, 1]} : vector<1x512xf32> to vector<1x128xf32>
    %209 = arith.negf %208 : vector<1x128xf32>
    %210 = math.exp %209 : vector<1x128xf32>
    %cst_46 = arith.constant 1.000000e+00 : f32
    %211 = vector.broadcast %cst_46 : f32 to vector<1x128xf32>
    %212 = arith.addf %211, %210 : vector<1x128xf32>
    %213 = arith.divf %211, %212 : vector<1x128xf32>
    %214 = vector.extract_strided_slice %201 {offsets = [0, 256], sizes = [1, 128], strides = [1, 1]} : vector<1x512xf32> to vector<1x128xf32>
    %215 = math.tanh %214 : vector<1x128xf32>
    %216 = vector.extract_strided_slice %201 {offsets = [0, 384], sizes = [1, 128], strides = [1, 1]} : vector<1x512xf32> to vector<1x128xf32>
    %217 = arith.negf %216 : vector<1x128xf32>
    %218 = math.exp %217 : vector<1x128xf32>
    %cst_47 = arith.constant 1.000000e+00 : f32
    %219 = vector.broadcast %cst_47 : f32 to vector<1x128xf32>
    %220 = arith.addf %219, %218 : vector<1x128xf32>
    %221 = arith.divf %219, %220 : vector<1x128xf32>
    %222 = arith.mulf %213, %191 : vector<1x128xf32>
    %223 = arith.mulf %207, %215 : vector<1x128xf32>
    %224 = arith.addf %222, %223 : vector<1x128xf32>
    %225 = math.tanh %224 : vector<1x128xf32>
    %226 = arith.mulf %221, %225 : vector<1x128xf32>
    %c5_i32 = arith.constant 5 : i32
    %227 = vector.broadcast %c5_i32 : i32 to vector<8x128xi32>
    %228 = arith.cmpi eq, %30, %227 : vector<8x128xi32>
    %229 = vector.shape_cast %226 : vector<1x128xf32> to vector<1x128xf32>
    %230 = vector.broadcast %229 : vector<1x128xf32> to vector<8x128xf32>
    %231 = arith.select %228, %230, %198 : vector<8x128xi1>, vector<8x128xf32>
    %232 = vector.extract_strided_slice %28 {offsets = [6, 0], sizes = [1, 512], strides = [1, 1]} : vector<8x512xf32> to vector<1x512xf32>
    %cst_48 = arith.constant dense<0.000000e+00> : vector<1x512xf32>
    %233 = tpu.matmul %226, %29, %cst_48 {dimension_numbers = #tpu.dot_dimension_numbers<[1], [0], [0], [1], [0, 0, 1, 1], [], []>} : vector<1x128xf32>, vector<128x512xf32>, vector<1x512xf32> -> vector<1x512xf32>
    %234 = arith.addf %232, %233 : vector<1x512xf32>
    %235 = vector.extract_strided_slice %234 {offsets = [0, 0], sizes = [1, 128], strides = [1, 1]} : vector<1x512xf32> to vector<1x128xf32>
    %236 = arith.negf %235 : vector<1x128xf32>
    %237 = math.exp %236 : vector<1x128xf32>
    %cst_49 = arith.constant 1.000000e+00 : f32
    %238 = vector.broadcast %cst_49 : f32 to vector<1x128xf32>
    %239 = arith.addf %238, %237 : vector<1x128xf32>
    %240 = arith.divf %238, %239 : vector<1x128xf32>
    %241 = vector.extract_strided_slice %234 {offsets = [0, 128], sizes = [1, 128], strides = [1, 1]} : vector<1x512xf32> to vector<1x128xf32>
    %242 = arith.negf %241 : vector<1x128xf32>
    %243 = math.exp %242 : vector<1x128xf32>
    %cst_50 = arith.constant 1.000000e+00 : f32
    %244 = vector.broadcast %cst_50 : f32 to vector<1x128xf32>
    %245 = arith.addf %244, %243 : vector<1x128xf32>
    %246 = arith.divf %244, %245 : vector<1x128xf32>
    %247 = vector.extract_strided_slice %234 {offsets = [0, 256], sizes = [1, 128], strides = [1, 1]} : vector<1x512xf32> to vector<1x128xf32>
    %248 = math.tanh %247 : vector<1x128xf32>
    %249 = vector.extract_strided_slice %234 {offsets = [0, 384], sizes = [1, 128], strides = [1, 1]} : vector<1x512xf32> to vector<1x128xf32>
    %250 = arith.negf %249 : vector<1x128xf32>
    %251 = math.exp %250 : vector<1x128xf32>
    %cst_51 = arith.constant 1.000000e+00 : f32
    %252 = vector.broadcast %cst_51 : f32 to vector<1x128xf32>
    %253 = arith.addf %252, %251 : vector<1x128xf32>
    %254 = arith.divf %252, %253 : vector<1x128xf32>
    %255 = arith.mulf %246, %224 : vector<1x128xf32>
    %256 = arith.mulf %240, %248 : vector<1x128xf32>
    %257 = arith.addf %255, %256 : vector<1x128xf32>
    %258 = math.tanh %257 : vector<1x128xf32>
    %259 = arith.mulf %254, %258 : vector<1x128xf32>
    %c6_i32 = arith.constant 6 : i32
    %260 = vector.broadcast %c6_i32 : i32 to vector<8x128xi32>
    %261 = arith.cmpi eq, %30, %260 : vector<8x128xi32>
    %262 = vector.shape_cast %259 : vector<1x128xf32> to vector<1x128xf32>
    %263 = vector.broadcast %262 : vector<1x128xf32> to vector<8x128xf32>
    %264 = arith.select %261, %263, %231 : vector<8x128xi1>, vector<8x128xf32>
    %265 = vector.extract_strided_slice %28 {offsets = [7, 0], sizes = [1, 512], strides = [1, 1]} : vector<8x512xf32> to vector<1x512xf32>
    %cst_52 = arith.constant dense<0.000000e+00> : vector<1x512xf32>
    %266 = tpu.matmul %259, %29, %cst_52 {dimension_numbers = #tpu.dot_dimension_numbers<[1], [0], [0], [1], [0, 0, 1, 1], [], []>} : vector<1x128xf32>, vector<128x512xf32>, vector<1x512xf32> -> vector<1x512xf32>
    %267 = arith.addf %265, %266 : vector<1x512xf32>
    %268 = vector.extract_strided_slice %267 {offsets = [0, 0], sizes = [1, 128], strides = [1, 1]} : vector<1x512xf32> to vector<1x128xf32>
    %269 = arith.negf %268 : vector<1x128xf32>
    %270 = math.exp %269 : vector<1x128xf32>
    %cst_53 = arith.constant 1.000000e+00 : f32
    %271 = vector.broadcast %cst_53 : f32 to vector<1x128xf32>
    %272 = arith.addf %271, %270 : vector<1x128xf32>
    %273 = arith.divf %271, %272 : vector<1x128xf32>
    %274 = vector.extract_strided_slice %267 {offsets = [0, 128], sizes = [1, 128], strides = [1, 1]} : vector<1x512xf32> to vector<1x128xf32>
    %275 = arith.negf %274 : vector<1x128xf32>
    %276 = math.exp %275 : vector<1x128xf32>
    %cst_54 = arith.constant 1.000000e+00 : f32
    %277 = vector.broadcast %cst_54 : f32 to vector<1x128xf32>
    %278 = arith.addf %277, %276 : vector<1x128xf32>
    %279 = arith.divf %277, %278 : vector<1x128xf32>
    %280 = vector.extract_strided_slice %267 {offsets = [0, 256], sizes = [1, 128], strides = [1, 1]} : vector<1x512xf32> to vector<1x128xf32>
    %281 = math.tanh %280 : vector<1x128xf32>
    %282 = vector.extract_strided_slice %267 {offsets = [0, 384], sizes = [1, 128], strides = [1, 1]} : vector<1x512xf32> to vector<1x128xf32>
    %283 = arith.negf %282 : vector<1x128xf32>
    %284 = math.exp %283 : vector<1x128xf32>
    %cst_55 = arith.constant 1.000000e+00 : f32
    %285 = vector.broadcast %cst_55 : f32 to vector<1x128xf32>
    %286 = arith.addf %285, %284 : vector<1x128xf32>
    %287 = arith.divf %285, %286 : vector<1x128xf32>
    %288 = arith.mulf %279, %257 : vector<1x128xf32>
    %289 = arith.mulf %273, %281 : vector<1x128xf32>
    %290 = arith.addf %288, %289 : vector<1x128xf32>
    %291 = math.tanh %290 : vector<1x128xf32>
    %292 = arith.mulf %287, %291 : vector<1x128xf32>
    %c7_i32 = arith.constant 7 : i32
    %293 = vector.broadcast %c7_i32 : i32 to vector<8x128xi32>
    %294 = arith.cmpi eq, %30, %293 : vector<8x128xi32>
    %295 = vector.shape_cast %292 : vector<1x128xf32> to vector<1x128xf32>
    %296 = vector.broadcast %295 : vector<1x128xf32> to vector<8x128xf32>
    %297 = arith.select %294, %296, %264 : vector<8x128xi1>, vector<8x128xf32>
    %c184 = arith.constant 184 : index
    %c0_56 = arith.constant 0 : index
    %298 = vector.load %arg5[%c184, %c0_56] : memref<320x64xf32, #tpu.memory_space<vmem>>, vector<128x36xf32>
    %cst_57 = arith.constant dense<0.000000e+00> : vector<8x36xf32>
    %299 = tpu.matmul %297, %298, %cst_57 {dimension_numbers = #tpu.dot_dimension_numbers<[1], [0], [0], [1], [0, 0, 1, 1], [], []>} : vector<8x128xf32>, vector<128x36xf32>, vector<8x36xf32> -> vector<8x36xf32>
    %c312 = arith.constant 312 : index
    %c0_58 = arith.constant 0 : index
    %300 = vector.load %arg5[%c312, %c0_58] : memref<320x64xf32, #tpu.memory_space<vmem>>, vector<1x36xf32>
    %301 = vector.broadcast %300 : vector<1x36xf32> to vector<8x36xf32>
    %302 = arith.addf %299, %301 : vector<8x36xf32>
    %c0_59 = arith.constant 0 : index
    %c0_60 = arith.constant 0 : index
    %303 = vector.load %arg3[%c0_59, %c0_60] : memref<8x12xf32, #tpu.memory_space<vmem>>, vector<8x12xf32>
    %304 = vector.extract_strided_slice %302 {offsets = [0, 0], sizes = [8, 8], strides = [1, 1]} : vector<8x36xf32> to vector<8x8xf32>
    %305 = vector.extract_strided_slice %302 {offsets = [0, 8], sizes = [8, 8], strides = [1, 1]} : vector<8x36xf32> to vector<8x8xf32>
    %306 = math.exp %305 : vector<8x8xf32>
    %307 = vector.extract_strided_slice %303 {offsets = [0, 0], sizes = [8, 8], strides = [1, 1]} : vector<8x12xf32> to vector<8x8xf32>
    %308 = arith.mulf %306, %307 : vector<8x8xf32>
    %309 = arith.addf %304, %308 : vector<8x8xf32>
    %310 = vector.extract_strided_slice %302 {offsets = [0, 24], sizes = [8, 4], strides = [1, 1]} : vector<8x36xf32> to vector<8x4xf32>
    %311 = vector.extract_strided_slice %302 {offsets = [0, 28], sizes = [8, 4], strides = [1, 1]} : vector<8x36xf32> to vector<8x4xf32>
    %312 = math.exp %311 : vector<8x4xf32>
    %313 = vector.extract_strided_slice %303 {offsets = [0, 8], sizes = [8, 4], strides = [1, 1]} : vector<8x12xf32> to vector<8x4xf32>
    %314 = arith.mulf %312, %313 : vector<8x4xf32>
    %315 = arith.addf %310, %314 : vector<8x4xf32>
    %316 = tpu.concatenate %14, %309 in 0 : vector<16x8xf32>, vector<8x8xf32> -> vector<24x8xf32>
    %c96 = arith.constant 96 : index
    %c0_61 = arith.constant 0 : index
    %317 = vector.load %arg5[%c96, %c0_61] : memref<320x64xf32, #tpu.memory_space<vmem>>, vector<8x64xf32>
    %cst_62 = arith.constant dense<0.000000e+00> : vector<24x64xf32>
    %318 = tpu.matmul %316, %317, %cst_62 {dimension_numbers = #tpu.dot_dimension_numbers<[1], [0], [0], [1], [0, 0, 1, 1], [], []>} : vector<24x8xf32>, vector<8x64xf32>, vector<24x64xf32> -> vector<24x64xf32>
    %c104 = arith.constant 104 : index
    %c0_63 = arith.constant 0 : index
    %319 = vector.load %arg5[%c104, %c0_63] : memref<320x64xf32, #tpu.memory_space<vmem>>, vector<1x64xf32>
    %320 = vector.broadcast %319 : vector<1x64xf32> to vector<24x64xf32>
    %321 = arith.addf %318, %320 : vector<24x64xf32>
    %cst_64 = arith.constant 0.000000e+00 : f32
    %322 = vector.broadcast %cst_64 : f32 to vector<24x64xf32>
    %323 = arith.maximumf %321, %322 : vector<24x64xf32>
    %c112 = arith.constant 112 : index
    %c0_65 = arith.constant 0 : index
    %324 = vector.load %arg5[%c112, %c0_65] : memref<320x64xf32, #tpu.memory_space<vmem>>, vector<64x16xf32>
    %cst_66 = arith.constant dense<0.000000e+00> : vector<24x16xf32>
    %325 = tpu.matmul %323, %324, %cst_66 {dimension_numbers = #tpu.dot_dimension_numbers<[1], [0], [0], [1], [0, 0, 1, 1], [], []>} : vector<24x64xf32>, vector<64x16xf32>, vector<24x16xf32> -> vector<24x16xf32>
    %c176 = arith.constant 176 : index
    %c0_67 = arith.constant 0 : index
    %326 = vector.load %arg5[%c176, %c0_67] : memref<320x64xf32, #tpu.memory_space<vmem>>, vector<1x16xf32>
    %327 = vector.broadcast %326 : vector<1x16xf32> to vector<24x16xf32>
    %328 = arith.addf %325, %327 : vector<24x16xf32>
    %329 = vector.extract_strided_slice %328 {offsets = [0, 0], sizes = [8, 16], strides = [1, 1]} : vector<24x16xf32> to vector<8x16xf32>
    %330 = vector.extract_strided_slice %328 {offsets = [8, 0], sizes = [8, 16], strides = [1, 1]} : vector<24x16xf32> to vector<8x16xf32>
    %331 = vector.extract_strided_slice %328 {offsets = [16, 0], sizes = [8, 16], strides = [1, 1]} : vector<24x16xf32> to vector<8x16xf32>
    %cst_68 = arith.constant 0.000000e+00 : f32
    %332 = vector.broadcast %cst_68 : f32 to vector<8x16xf32>
    %333 = tpu.concatenate %15, %16, %309, %315, %302, %329, %330, %331, %332 in 1 : vector<8x8xf32>, vector<8x8xf32>, vector<8x8xf32>, vector<8x4xf32>, vector<8x36xf32>, vector<8x16xf32>, vector<8x16xf32>, vector<8x16xf32>, vector<8x16xf32> -> vector<8x128xf32>
    %c0_69 = arith.constant 0 : index
    %c0_70 = arith.constant 0 : index
    %334 = vector.load %arg6[%c0_69, %c0_70] : memref<8x128xf32, #tpu.memory_space<vmem>>, vector<8x128xf32>
    tpu.vector_store %arg6[%c0_69, %c0_70], %333 {strides = array<i32>} : memref<8x128xf32, #tpu.memory_space<vmem>>, vector<8x128xf32>,
    return
  }
}

</mosaic_0001>

<bundles_post_ra>
// kernel: upn_forward.1
= control target key start
LH: loop header
LB: loop body
LE: loop exit
PB: predicated region body
PF: predicated region fallthrough
CT: control target
= control target key end

     0   :  { %11 = vsyncpa [#allocation3], 0  ;;  %s3601_s21 = smov [#allocation2]   ;;  %s4337_s0 = inlined_call_operand.vmem [shape: f32[8,16], index: 0, kind: input, shape index: {}]   ;;  %s4338_s1 = inlined_call_operand.vmem [shape: f32[8,16], index: 1, kind: input, shape index: {}]   ;;  %s4339_s2 = inlined_call_operand.vmem [shape: f32[8,4], index: 2, kind: input, shape index: {}]   ;;  %s4340_s3 = inlined_call_operand.vmem [shape: f32[8,12], index: 3, kind: input, shape index: {}]   ;;  %s4341_s4 = inlined_call_operand.hbm [shape: f32[160,512], index: 4, kind: input, shape index: {}]   ;;  %s4342_s5 = inlined_call_operand.vmem [shape: f32[320,64], index: 5, kind: input, shape index: {}]   ;;  %s4343_s6 = inlined_call_operand.vmem [shape: f32[8,128], index: 6, kind: output, shape index: {}]  }
   0x1   :  { %s25_s22 = sshll.u32 %s3601_s21, 4  ;;  %s3577_s25 = scalar_lea.hbm %s4341_s4, 10240  ;;  %s26_s22 = int_to_ptr.vmem [resolvable:$true] %s25_s22 }
   0x2   :  { %p3578_p0 = scmp.ne.s32.totalorder %s4341_s4, %s3577_s25  ;;  %p3581_p1 = scmp.lt.u32.totalorder %s3577_s25, %s4341_s4 }
   0x4   :  { %p3583_p2 = pnand %p3581_p1, %p3578_p0 }
   0x6   :  { %3586 = shalt.err (!%p3583_p2)
}
   0x7   :  { %s3587_s30 = scalar_lea.vmem %s26_s22, 10240  ;;  %p3592_p4 = scmp.lt.s32.totalorder %s26_s22, %s26_s22 }
   0x8   :  { %p3588_p3 = scmp.ne.s32.totalorder %s26_s22, %s3587_s30  ;;  %p3593_p5 = scmp.lt.s32.totalorder %s3587_s30, %s3587_s30 }
   0xa   :  { %p3594_p6 = por %p3593_p5, %p3592_p4 }
   0xc   :  { %p3595_p7 = pnand %p3594_p6, %p3588_p3 }
   0xe   :  { %3598 = shalt.err (!%p3595_p7)
}
   0xf   :  { %s3602_s7 = smov 512   ;;  %s3603_s8 = smov 32  }
  0x10   :  { %31 = dma.hbm_to_vmem [thread:$0]  %s4341_s4, 10240, %s26_s22, [#allocation3], %s3602_s7, %s3602_s7, %s3603_s8  }
  0x11   :  { %3599 = dma.done.wait [#allocation3], 10240  }
  0x12   :  { %3600 = vsyncadd [#allocation3], 4294957056  ;;  %vm46_vm0 = vcmask 130048   ;;  %v39_v0 = vld [vmem:[%s4342_s5] sm:$0xff]  ;;  %v40_v1 = vld [vmem:[%s4342_s5 + $0x8] sm:$0xff]  ;;  %vm238_vm1 = vcmask 1043456  }
  0x13   :  { %v37_v2 = vld [vmem:[%s4337_s0] sm:$0xff]  ;;  %v2856_v3 = vpack.c.bf16 %v40_v1, %v39_v0  ;;  %v130_v4 = vld [vmem:[%s4342_s5 + $0x18] sm:$0xff]  ;;  %v132_v7 = vld [vmem:[%s4342_s5 + $0x28] sm:$0xff]  ;;  %v3604_v23 = vmov 0.0   ;;  %vm234_vm2 = vcmask 31744   ;;  %vm143_vm3 = vcmask 523264  }
  0x14   :  { %2763 = vmatprep.mubr.msk.f32.mxu1 %vm46_vm0, %v37_v2  ;;  %v131_v5 = vld [vmem:[%s4342_s5 + $0x20] sm:$0xff]  ;;  %v133_v8 = vld [vmem:[%s4342_s5 + $0x30] sm:$0xff]  ;;  %v134_v11 = vld [vmem:[%s4342_s5 + $0x38] sm:$0xff]  ;;  %315 = vmatprep.mubr.f32.mxu0 %v3604_v23  ;;  %vm393_vm4 = vcmask 64512   ;;  %vm3605_vm12 = vmmov 0   ;;  %s3607_s20 = smov 20  }
  0x15   :  { %v2860_v6 = vpack.c.bf16 %v131_v5, %v130_v4  ;;  %2857 = vmatprep.subr.bf16.mxu1 %v2856_v3  ;;  %v38_v9 = vld [vmem:[%s4338_s1] sm:$0xff]  ;;  %v2864_v10 = vpack.c.bf16 %v133_v8, %v132_v7  ;;  %v136_v14 = vld [vmem:[%s4342_s5 + $0x48] sm:$0xff]  ;;  %v137_v15 = vld [vmem:[%s4342_s5 + $0x50] sm:$0xff]  ;;  %s3608_s21 = smov 8   ;;  %s3609_s12 = smov 124   ;;  %vm2647_vm14 = vcmask 195584  }
  0x16   :  { %2859 = vmatpush3.bf16.msra.mxu1 %v2856_v3  ;;  %v135_v12 = vld [vmem:[%s4342_s5 + $0x40] sm:$0xff]  ;;  %v2872_v16 = vpack.c.bf16 %v137_v15, %v136_v14  ;;  %v720_v17 = vld [vmem:[#allocation2 + $0x8] sm:$0xff]  ;;  %v233_v22 = vld [vmem:[#allocation2 + $0x238] sm:$0xf]  ;;  %s3610_s13 = smov 120   ;;  %s3611_s14 = smov 28  }
  0x17   :  { %2861 = vmatprep.subr.bf16.mxu1 %v2860_v6  ;;  %v2868_v13 = vpack.c.bf16 %v135_v12, %v134_v11  ;;  %v724_v18 = vld [vmem:[#allocation2 + $0x28] sm:$0xff]  ;;  %v230_v21 = vld [vmem:[#allocation2 + $0x220] sm:$0xf]  ;;  %v232_v25 = vld [vmem:[#allocation2 + $0x230] sm:$0xf]  ;;  %s3612_s17 = smov 16  }
  0x18   :  { %v3701_v19 = vpack.c.bf16 %v724_v18, %v720_v17  ;;  %v231_v20 = vld [vmem:[#allocation2 + $0x228] sm:$0xf]  ;;  %v225_v24 = vld [vmem:[%s4339_s2] sm:$0xff]  ;;  %v2664_v27 = vld [vmem:[%s4342_s5 + $0x10] ss:$0 sm:$0xff]  ;;  %s3613_s19 = smov 64  }
  0x19   :  { %2764 = vmatmul.mubr.msk.f32.vlgmr.msra.gmra.mrb[0].mxu1 %vm46_vm0, %v38_v9  ;;  %2670 = vmatprep.subr.msk.mxu0 %vm238_vm1, %v231_v20  ;;  %v227_v26 = vld [vmem:[#allocation2 + $0x208] sm:$0xff]  ;;  %v719_v31 = vld [vmem:[#allocation2] sm:$0xff]  ;;  %v229_v4 = vld [vmem:[#allocation2 + $0x218] sm:$0xff]  ;;  %vm2649_vm15 = vcmask 228352  }
  0x1a   :  { %2863 = vmatpush3.bf16.msra.mxu1 %v2860_v6  ;;  %2671 = vmatpush1.msk.msra.mxu0 %vm238_vm1, %v230_v21  ;;  %v723_v32 = vld [vmem:[#allocation2 + $0x20] sm:$0xff]  ;;  %v728_v34 = vld [vmem:[#allocation2 + $0x48] sm:$0xff]  ;;  %v2667_v17 = vld [vmem:[%s4342_s5 + $0x58] ss:$0 sm:$0xff] }
  0x1b   :  { %2865 = vmatprep.subr.bf16.mxu1 %v2864_v10  ;;  %2673 = vmatprep.subr.msk.mxu0 %vm238_vm1, %v233_v22  ;;  %v732_v35 = vld [vmem:[#allocation2 + $0x68] sm:$0xff]  ;;  %v3713_v37 = vpack.c.bf16 %v723_v32, %v719_v31  ;;  %v727_v40 = vld [vmem:[#allocation2 + $0x40] sm:$0xff]  ;;  %v228_v22 = vld [vmem:[#allocation2 + $0x210] sm:$0xff] }
  0x1c   :  { %2672 = vmatmul.mubr.msk.f32.vlgmr.msra.gmra.mrb[0].mxu0 %vm234_vm2, %v225_v24  ;;  %v3715_v39 = vpack.c.bf16 %v732_v35, %v728_v34  ;;  %v731_v41 = vld [vmem:[#allocation2 + $0x60] sm:$0xff]  ;;  %v736_v42 = vld [vmem:[#allocation2 + $0x88] sm:$0xff]  ;;  %v721_v32 = vld [vmem:[#allocation2 + $0x10] sm:$0xff] }
  0x1d   :  { %2674 = vmatpush1.msk.msra.mxu0 %vm238_vm1, %v232_v25  ;;  %386 = vmatprep.mubr.f32.mxu0 %v3604_v23  ;;  %v740_v43 = vld [vmem:[#allocation2 + $0xa8] sm:$0xff]  ;;  %v3720_v44 = vpack.c.bf16 %v731_v41, %v727_v40  ;;  %v735_v46 = vld [vmem:[#allocation2 + $0x80] sm:$0xff]  ;;  %v730_v34 = vld [vmem:[#allocation2 + $0x58] sm:$0xff]  ;;  %vm2652_vm1 = vcmask 654336  }
  0x1e   :  { %2867 = vmatpush3.bf16.msra.mxu1 %v2864_v10  ;;  %397 = vmatprep.subr.mxu0 %v227_v26  ;;  %v3724_v45 = vpack.c.bf16 %v740_v43, %v736_v42  ;;  %v739_v47 = vld [vmem:[#allocation2 + $0xa0] sm:$0xff]  ;;  %v744_v48 = vld [vmem:[#allocation2 + $0xc8] sm:$0xff]  ;;  %v542_v26 = vld [vmem:[#allocation2 + $0x258] sm:$0xff] }
  0x1f   :  { %2869 = vmatprep.subr.bf16.mxu1 %v2868_v13  ;;  %v748_v49 = vld [vmem:[#allocation2 + $0xe8] sm:$0xff]  ;;  %v3727_v50 = vpack.c.bf16 %v739_v47, %v735_v46  ;;  %v743_v52 = vld [vmem:[#allocation2 + $0xc0] sm:$0xff]  ;;  %v734_v35 = vld [vmem:[#allocation2 + $0x78] sm:$0xff] }
  0x20   :  { %2675 = vmatmul.mubr.msk.f32.vlgmr.msra.gmra.mrb[2].mxu0 %vm234_vm2, %v225_v24  ;;  %v3730_v51 = vpack.c.bf16 %v748_v49, %v744_v48  ;;  %v747_v53 = vld [vmem:[#allocation2 + $0xe0] sm:$0xff]  ;;  %v752_v54 = vld [vmem:[#allocation2 + $0x108] sm:$0xff]  ;;  %v729_v40 = vld [vmem:[#allocation2 + $0x50] sm:$0xff]  ;;  %vm2654_vm2 = vcmask 785408  }
  0x21   :  { %461 = vmatprep.mubr.f32.mxu0 %v3604_v23  ;;  %v756_v55 = vld [vmem:[#allocation2 + $0x128] sm:$0xff]  ;;  %v3733_v56 = vpack.c.bf16 %v747_v53, %v743_v52  ;;  %v751_v58 = vld [vmem:[#allocation2 + $0x100] sm:$0xff]  ;;  %v733_v41 = vld [vmem:[#allocation2 + $0x70] sm:$0xff] }
  0x22   :  { %2871 = vmatpush3.bf16.msra.mxu1 %v2868_v13  ;;  %v3736_v57 = vpack.c.bf16 %v756_v55, %v752_v54  ;;  %v755_v59 = vld [vmem:[#allocation2 + $0x120] sm:$0xff]  ;;  %v760_v61 = vld [vmem:[#allocation2 + $0x148] sm:$0xff]  ;;  %v738_v42 = vld [vmem:[#allocation2 + $0x98] sm:$0xff]  ;;  %v3806_v46 = vpack.c.bf16 %v733_v41, %v729_v40 }
  0x23   :  { %2873 = vmatprep.subr.bf16.mxu1 %v2872_v16  ;;  %v3739_v60 = vpack.c.bf16 %v755_v59, %v751_v58  ;;  %v764_v62 = vld [vmem:[#allocation2 + $0x168] sm:$0xff]  ;;  %v759_v0 = vld [vmem:[#allocation2 + $0x140] sm:$0xff]  ;;  %v742_v43 = vld [vmem:[#allocation2 + $0xb8] sm:$0xff] }
  0x24   :  { %v3743_v63 = vpack.c.bf16 %v764_v62, %v760_v61  ;;  %v763_v1 = vld [vmem:[#allocation2 + $0x160] sm:$0xff]  ;;  %v768_v5 = vld [vmem:[#allocation2 + $0x188] sm:$0xff]  ;;  %v3810_v47 = vpack.c.bf16 %v742_v43, %v738_v42  ;;  %v737_v48 = vld [vmem:[#allocation2 + $0x90] sm:$0xff] }
  0x25   :  { %v226_v2 = vld [vmem:[#allocation2 + $0x200] sm:$0xff]  ;;  %v3745_v3 = vpack.c.bf16 %v763_v1, %v759_v0  ;;  %v772_v6 = vld [vmem:[#allocation2 + $0x1a8] sm:$0xff]  ;;  %v741_v49 = vld [vmem:[#allocation2 + $0xb0] sm:$0xff] }
  0x26   :  { %2875 = vmatpush3.bf16.msra.mxu1 %v2872_v16  ;;  %398 = vmatpush1.msra.mxu0 %v226_v2  ;;  %v3749_v7 = vpack.c.bf16 %v772_v6, %v768_v5  ;;  %v767_v8 = vld [vmem:[#allocation2 + $0x180] sm:$0xff]  ;;  %v776_v11 = vld [vmem:[#allocation2 + $0x1c8] sm:$0xff]  ;;  %v746_v52 = vld [vmem:[#allocation2 + $0xd8] sm:$0xff]  ;;  %v3813_v54 = vpack.c.bf16 %v741_v49, %v737_v48 }
  0x27   :  { %2877 = vmatprep.subr.bf16.mxu1 %v3701_v19  ;;  %468 = vmatprep.subr.mxu0 %v229_v4  ;;  %v771_v9 = vld [vmem:[#allocation2 + $0x1a0] sm:$0xff]  ;;  %v780_v12 = vld [vmem:[#allocation2 + $0x1e8] sm:$0xff]  ;;  %v750_v53 = vld [vmem:[#allocation2 + $0xf8] sm:$0xff] }
  0x28   :  { %v3751_v10 = vpack.c.bf16 %v771_v9, %v767_v8  ;;  %v3755_v13 = vpack.c.bf16 %v780_v12, %v776_v11  ;;  %v775_v14 = vld [vmem:[#allocation2 + $0x1c0] sm:$0xff]  ;;  %v540_v24 = vld [vmem:[#allocation2 + $0x248] sm:$0xff]  ;;  %v3816_v55 = vpack.c.bf16 %v750_v53, %v746_v52  ;;  %v745_v58 = vld [vmem:[#allocation2 + $0xd0] sm:$0xff] }
  0x29   :  { %v779_v15 = vld [vmem:[#allocation2 + $0x1e0] sm:$0xff]  ;;  %v749_v59 = vld [vmem:[#allocation2 + $0xf0] sm:$0xff]  ;;  %v754_v61 = vld [vmem:[#allocation2 + $0x118] sm:$0xff] }
  0x2a   :  { %v3757_v16 = vpack.c.bf16 %v779_v15, %v775_v14  ;;  %v539_v25 = vld [vmem:[#allocation2 + $0x240] sm:$0xff]  ;;  %v758_v62 = vld [vmem:[#allocation2 + $0x138] sm:$0xff]  ;;  %v3819_v0 = vpack.c.bf16 %v749_v59, %v745_v58  ;;  %v753_v2 = vld [vmem:[#allocation2 + $0x110] sm:$0xff] }
  0x2b   :  { %v3822_v1 = vpack.c.bf16 %v758_v62, %v754_v61  ;;  %v757_v4 = vld [vmem:[#allocation2 + $0x130] sm:$0xff]  ;;  %v762_v5 = vld [vmem:[#allocation2 + $0x158] sm:$0xff] }
  0x2c   :  { %v766_v6 = vld [vmem:[#allocation2 + $0x178] sm:$0xff]  ;;  %v3825_v8 = vpack.c.bf16 %v757_v4, %v753_v2  ;;  %v761_v11 = vld [vmem:[#allocation2 + $0x150] sm:$0xff] }
  0x2d   :  { %v3828_v9 = vpack.c.bf16 %v766_v6, %v762_v5  ;;  %v765_v12 = vld [vmem:[#allocation2 + $0x170] sm:$0xff]  ;;  %v770_v14 = vld [vmem:[#allocation2 + $0x198] sm:$0xff] }
  0x2e   :  { %v774_v15 = vld [vmem:[#allocation2 + $0x1b8] sm:$0xff] }
  0x2f   :  { %v693_v43 = vld [vmem:[#allocation2 + $0x260] ss:$8 sm:$0xf] }
  0xec   :  { %v2765_v28 = vpop.f32.mrb[0].mxu1 }
  0xed   :  { %v125_v29 = vadd.f32 %v2765_v28, %v2664_v27  ;;  %v119_v30 = vpop.f32.mrb[1].mxu1  ;;  %v726_v28 = vld [vmem:[#allocation2 + $0x38] sm:$0xff] }
  0xee   :  { %v120_v33 = vadd.f32 %v2664_v27, %v119_v30  ;;  %v722_v27 = vld [vmem:[#allocation2 + $0x18] sm:$0xff]  ;;  %v541_v30 = vld [vmem:[#allocation2 + $0x250] sm:$0xff] }
  0xef   :  { %v129_v38 = vmax.f32 %v125_v29, 0.0  ;;  %v3793_v31 = vpack.c.bf16 %v726_v28, %v722_v27  ;;  %v777_v28 = vld [vmem:[#allocation2 + $0x1d0] sm:$0xff] }
  0xf0   :  { %v128_v36 = vmax.f32 %v120_v33, 0.0  ;;  %v725_v33 = vld [vmem:[#allocation2 + $0x30] sm:$0xff] }
  0xf2   :  { %2782 = vmatprep.mubr.msk.f32.mxu1 %vm143_vm3, %v128_v36  ;;  %v3798_v36 = vpack.c.bf16 %v725_v33, %v721_v32 }
  0xf3   :  { %2783 = vmatmul.mubr.msk.f32.vlgmr.msra.gmra.mrb[2].mxu1 %vm143_vm3, %v129_v38  ;;  %v3801_v38 = vpack.c.bf16 %v734_v35, %v730_v34  ;;  %v695_v35 = vlaneseq }
  0xf4   :  { %2879 = vmatpush1.bf16.msra.mxu1 %v3713_v37  ;;  %849 = vmatprep.mubr.f32.mxu1 %v3604_v23 }
  0xf5   :  { %2881 = vmatprep.subr.bf16.mxu1 %v3715_v39  ;;  %v3866_v40 = vshrl.u32 %v695_v35, 7 }
  0xf7   :  { %v701_v42 = vsub.s32 1, %v3866_v40  ;;  %v697_v48 = vsub.s32 0, %v3866_v40  ;;  %vm955_vm5 = vcmp.eq.s32.totalorder %v3866_v40, 0  ;;  %vm1146_vm6 = vcmp.eq.s32.totalorder %v3866_v40, 1 }
  0xf8   :  { %2883 = vmatpush1.bf16.msra.mxu1 %v3720_v44  ;;  %vm1340_vm7 = vcmp.eq.s32.totalorder %v3866_v40, 2  ;;  %vm1534_vm8 = vcmp.eq.s32.totalorder %v3866_v40, 3  ;;  %vm1728_vm9 = vcmp.eq.s32.totalorder %v3866_v40, 4  ;;  %vm1922_vm10 = vcmp.eq.s32.totalorder %v3866_v40, 5 }
  0xf9   :  { %2885 = vmatprep.subr.bf16.mxu1 %v3724_v45  ;;  %v702_v52 = vrot.slane %v693_v43, %v701_v42  ;;  %v698_v58 = vrot.slane %v693_v43, %v697_v48  ;;  %vm2116_vm11 = vcmp.eq.s32.totalorder %v3866_v40, 6  ;;  %vm2310_vm13 = vcmp.eq.s32.totalorder %v3866_v40, 7 }
  0xfc   :  { %2887 = vmatpush1.bf16.msra.mxu1 %v3727_v50 }
  0xfd   :  { %2889 = vmatprep.subr.bf16.mxu1 %v3730_v51 }
 0x100   :  { %2891 = vmatpush1.bf16.msra.mxu1 %v3733_v56 }
 0x101   :  { %2893 = vmatprep.subr.bf16.mxu1 %v3736_v57 }
 0x104   :  { %2895 = vmatpush1.bf16.msra.mxu1 %v3739_v60 }
 0x105   :  { %2897 = vmatprep.subr.bf16.mxu1 %v3743_v63 }
 0x108   :  { %2899 = vmatpush1.bf16.msra.mxu1 %v3745_v3 }
 0x109   :  { %2901 = vmatprep.subr.bf16.mxu1 %v3749_v7 }
 0x10c   :  { %2903 = vmatpush1.bf16.msra.mxu1 %v3751_v10 }
 0x10d   :  { %2905 = vmatprep.subr.bf16.mxu1 %v3755_v13 }
 0x110   :  { %2907 = vmatpush1.bf16.msra.mxu1 %v3757_v16 }
 0x111   :  { %2941 = vmatprep.subr.bf16.mxu1 %v3701_v19 }
 0x113   :  { %850 = vmatmul.mubr.f32.vlgmr.msra.gmra.mrb[4].mxu1 %v3604_v23 }
 0x114   :  { %2943 = vmatpush1.bf16.msra.mxu1 %v3713_v37  ;;  %1025 = vmatprep.mubr.f32.mxu1 %v3604_v23 }
 0x115   :  { %2945 = vmatprep.subr.bf16.mxu1 %v3715_v39 }
 0x118   :  { %2947 = vmatpush1.bf16.msra.mxu1 %v3720_v44 }
 0x119   :  { %2949 = vmatprep.subr.bf16.mxu1 %v3724_v45 }
 0x11c   :  { %2951 = vmatpush1.bf16.msra.mxu1 %v3727_v50 }
 0x11d   :  { %2953 = vmatprep.subr.bf16.mxu1 %v3730_v51 }
 0x120   :  { %2955 = vmatpush1.bf16.msra.mxu1 %v3733_v56 }
 0x121   :  { %2957 = vmatprep.subr.bf16.mxu1 %v3736_v57 }
 0x124   :  { %2959 = vmatpush1.bf16.msra.mxu1 %v3739_v60 }
 0x125   :  { %2961 = vmatprep.subr.bf16.mxu1 %v3743_v63 }
 0x128   :  { %2963 = vmatpush1.bf16.msra.mxu1 %v3745_v3 }
 0x129   :  { %2965 = vmatprep.subr.bf16.mxu1 %v3749_v7 }
 0x12c   :  { %2967 = vmatpush1.bf16.msra.mxu1 %v3751_v10 }
 0x12d   :  { %2969 = vmatprep.subr.bf16.mxu1 %v3755_v13 }
 0x130   :  { %2971 = vmatpush1.bf16.msra.mxu1 %v3757_v16 }
 0x131   :  { %3005 = vmatprep.subr.bf16.mxu1 %v3701_v19 }
 0x1c6   :  { %v2784_v18 = vpop.f32.mrb[2].mxu1 }
 0x1c7   :  { %v216_v20 = vpop.f32.mrb[3].mxu1  ;;  %v3791_v29 = vadd.f32 %v2784_v18, %v2667_v17  ;;  %v3834_v18 = vpack.c.bf16 %v774_v15, %v770_v14 }
 0x1c8   :  { %v3783_v21 = vadd.f32 %v2667_v17, %v216_v20  ;;  %v3831_v17 = vpack.c.bf16 %v765_v12, %v761_v11  ;;  %v769_v20 = vld [vmem:[#allocation2 + $0x190] sm:$0xff]  ;;  %v705_v11 = vsub.s32 2, %v3866_v40  ;;  %v709_v12 = vsub.s32 3, %v3866_v40 }
 0x1ca   :  { %2676 = vmatmul.mubr.msk.f32.vlgmr.msra.gmra.mrb[0].mxu0 %vm393_vm4, %v3783_v21 }
 0x1cb   :  { %469 = vmatpush1.msra.mxu0 %v228_v22  ;;  %532 = vmatprep.mubr.f32.mxu0 %v3604_v23  ;;  %v773_v22 = vld [vmem:[#allocation2 + $0x1b0] sm:$0xff] }
 0x1cc   :  { %546 = vmatprep.subr.mxu0 %v540_v24  ;;  %v778_v24 = vld [vmem:[#allocation2 + $0x1d8] sm:$0xff] }
 0x1ce   :  { %2677 = vmatmul.mubr.msk.f32.vlgmr.msra.gmra.mrb[2].mxu0 %vm393_vm4, %v3783_v21 }
 0x1cf   :  { %547 = vmatpush1.msra.mxu0 %v539_v25  ;;  %610 = vmatprep.mubr.f32.mxu0 %v3604_v23  ;;  %v782_v25 = vld [vmem:[#allocation2 + $0x1f8] sm:$0xff] }
 0x1d0   :  { %617 = vmatprep.subr.mxu0 %v542_v26  ;;  %v3837_v26 = vpack.c.bf16 %v773_v22, %v769_v20  ;;  %v3840_v27 = vpack.c.bf16 %v782_v25, %v778_v24  ;;  %v706_v20 = vrot.slane %v693_v43, %v705_v11  ;;  %v710_v22 = vrot.slane %v693_v43, %v709_v12 }
 0x1d2   :  { %2678 = vmatmul.mubr.msk.f32.vlgmr.msra.gmra.mrb[0].mxu0 %vm393_vm4, %v3791_v29 }
 0x1d3   :  { %618 = vmatpush1.msra.mxu0 %v541_v30  ;;  %681 = vmatprep.mubr.f32.mxu0 %v3604_v23  ;;  %v781_v30 = vld [vmem:[#allocation2 + $0x1f0] sm:$0xff] }
 0x1d4   :  { %2909 = vmatprep.subr.bf16.mxu0 %v3793_v31  ;;  %v3843_v32 = vpack.c.bf16 %v781_v30, %v777_v28 }
 0x1d6   :  { %2679 = vmatmul.mubr.msk.f32.vlgmr.msra.gmra.mrb[2].mxu0 %vm393_vm4, %v3791_v29 }
 0x1d7   :  { %2911 = vmatpush1.bf16.msra.mxu0 %v3798_v36  ;;  %920 = vmatprep.mubr.f32.mxu0 %v3604_v23 }
 0x1d8   :  { %2913 = vmatprep.subr.bf16.mxu0 %v3801_v38 }
 0x1db   :  { %2915 = vmatpush1.bf16.msra.mxu0 %v3806_v46 }
 0x1dc   :  { %2917 = vmatprep.subr.bf16.mxu0 %v3810_v47 }
 0x1df   :  { %2919 = vmatpush1.bf16.msra.mxu0 %v3813_v54 }
 0x1e0   :  { %2921 = vmatprep.subr.bf16.mxu0 %v3816_v55 }
 0x1e3   :  { %2923 = vmatpush1.bf16.msra.mxu0 %v3819_v0 }
 0x1e4   :  { %2925 = vmatprep.subr.bf16.mxu0 %v3822_v1 }
 0x1e6   :  { %v851_v33 = vpop.f32.mrb[4].mxu1 }
 0x1e7   :  { %2927 = vmatpush1.bf16.msra.mxu0 %v3825_v8  ;;  %v853_v34 = vpop.f32.mrb[5].mxu1 }
 0x1e8   :  { %2929 = vmatprep.subr.bf16.mxu0 %v3828_v9 }
 0x1eb   :  { %2931 = vmatpush1.bf16.msra.mxu0 %v3831_v17 }
 0x1ec   :  { %2933 = vmatprep.subr.bf16.mxu0 %v3834_v18 }
 0x1ef   :  { %2935 = vmatpush1.bf16.msra.mxu0 %v3837_v26 }
 0x1f0   :  { %2937 = vmatprep.subr.bf16.mxu0 %v3840_v27 }
 0x1f3   :  { %2939 = vmatpush1.bf16.msra.mxu0 %v3843_v32 }
 0x1f4   :  { %2973 = vmatprep.subr.bf16.mxu0 %v3793_v31 }
 0x1f6   :  { %921 = vmatmul.mubr.f32.vlgmr.msra.gmra.mrb[4].mxu0 %v3604_v23 }
 0x1f7   :  { %2975 = vmatpush1.bf16.msra.mxu0 %v3798_v36  ;;  %1096 = vmatprep.mubr.f32.mxu0 %v3604_v23 }
 0x1f8   :  { %2977 = vmatprep.subr.bf16.mxu0 %v3801_v38 }
 0x1fb   :  { %2979 = vmatpush1.bf16.msra.mxu0 %v3806_v46 }
 0x1fc   :  { %2981 = vmatprep.subr.bf16.mxu0 %v3810_v47 }
 0x1ff   :  { %2983 = vmatpush1.bf16.msra.mxu0 %v3813_v54 }
 0x200   :  { %2985 = vmatprep.subr.bf16.mxu0 %v3816_v55 }
 0x203   :  { %2987 = vmatpush1.bf16.msra.mxu0 %v3819_v0 }
 0x204   :  { %2989 = vmatprep.subr.bf16.mxu0 %v3822_v1 }
 0x207   :  { %2991 = vmatpush1.bf16.msra.mxu0 %v3825_v8 }
 0x208   :  { %2993 = vmatprep.subr.bf16.mxu0 %v3828_v9 }
 0x20b   :  { %2995 = vmatpush1.bf16.msra.mxu0 %v3831_v17 }
 0x20c   :  { %2997 = vmatprep.subr.bf16.mxu0 %v3834_v18 }
 0x20f   :  { %2999 = vmatpush1.bf16.msra.mxu0 %v3837_v26 }
 0x210   :  { %3001 = vmatprep.subr.bf16.mxu0 %v3840_v27 }
 0x213   :  { %3003 = vmatpush1.bf16.msra.mxu0 %v3843_v32 }
 0x214   :  { %3037 = vmatprep.subr.bf16.mxu0 %v3793_v31 }
 0x2a5   :  { %v612_v41 = vpop.f32.mrb[0].mxu0 }
 0x2a6   :  { %v614_v49 = vpop.f32.mrb[1].mxu0  ;;  %v3876_v62 = vadd.f32 %v698_v58, %v612_v41 }
 0x2a7   :  { %v3874_v61 = vadd.f32 %v702_v52, %v614_v49 }
 0x2a8   :  { %v927_v4 = vadd.f32 %v851_v33, %v3876_v62 }
 0x2a9   :  { %v683_v53 = vpop.f32.mrb[2].mxu0  ;;  %v928_v2 = vadd.f32 %v853_v34, %v3874_v61 }
 0x2aa   :  { %v685_v59 = vpop.f32.mrb[3].mxu0  ;;  %v2680_v6 = vmul.f32 -1.442695, %v927_v4  ;;  %v3886_v28 = vadd.f32 %v706_v20, %v683_v53 }
 0x2ab   :  { %v2681_v5 = vmul.f32 -1.442695, %v928_v2  ;;  %v3888_v30 = vadd.f32 %v710_v22, %v685_v59 }
 0x2ad   :  { %3447 = vpow2.f32 %v2681_v5 }
 0x2ae   :  { %3449 = vpow2.f32 %v2680_v6 }
 0x2b7   :  { %v3448_v14 = vpop.eup %3447 }
 0x2b8   :  { %v3450_v15 = vpop.eup %3449  ;;  %v940_v24 = vadd.f32 1.0, %v3448_v14 }
 0x2b9   :  { %v934_v25 = vadd.f32 1.0, %v3450_v15 }
 0x2ba   :  { %3451 = vrcp.f32 %v940_v24 }
 0x2bb   :  { %3453 = vrcp.f32 %v934_v25 }
 0x2c4   :  { %v3452_v52 = vpop.eup %3451 }
 0x2c5   :  { %v3454_v58 = vpop.eup %3453  ;;  %v950_v2 = vmul.f32 0.0, %v3452_v52 }
 0x2c9   :  { %v922_v33 = vpop.f32.mrb[4].mxu0 }
 0x2ca   :  { %v929_v34 = vadd.f32 %v922_v33, %v3886_v28  ;;  %v924_v35 = vpop.f32.mrb[5].mxu0 }
 0x2cb   :  { %v930_v41 = vadd.f32 %v924_v35, %v3888_v30 }
 0x2cc   :  { %3455 = vtanh.f32 %v929_v34 }
 0x2cd   :  { %v2682_v49 = vmul.f32 -1.442695, %v930_v41 }
 0x2cf   :  { %3457 = vpow2.f32 %v2682_v49 }
 0x2d6   :  { %v3456_v43 = vpop.eup %3455 }
 0x2d7   :  { %v951_v4 = vmul.f32 %v3456_v43, %v3454_v58 }
 0x2d9   :  { %v3458_v53 = vpop.eup %3457  ;;  %v3892_v5 = vadd.f32 %v951_v4, %v950_v2 }
 0x2da   :  { %v947_v59 = vadd.f32 1.0, %v3458_v53 }
 0x2db   :  { %3459 = vtanh.f32 %v3892_v5 }
 0x2dc   :  { %3461 = vrcp.f32 %v947_v59 }
 0x2e5   :  { %v3460_v6 = vpop.eup %3459 }
 0x2e6   :  { %v3462_v14 = vpop.eup %3461 }
 0x2e7   :  { %v3895_v15 = vmul.f32 %v3462_v14, %v3460_v6 }
 0x2e9   :  { %1026 = vmatmul.mubr.f32.vlgmr.msra.gmra.mrb[6].mxu1 %v3895_v15  ;;  %1097 = vmatmul.mubr.f32.vlgmr.msra.gmra.mrb[6].mxu0 %v3895_v15 }
 0x2ea   :  { %3007 = vmatpush1.bf16.msra.mxu1 %v3713_v37  ;;  %3039 = vmatpush1.bf16.msra.mxu0 %v3798_v36 }
 0x2eb   :  { %3009 = vmatprep.subr.bf16.mxu1 %v3715_v39  ;;  %3041 = vmatprep.subr.bf16.mxu0 %v3801_v38 }
 0x2ec   :  { %1219 = vmatprep.mubr.f32.mxu1 %v3604_v23  ;;  %1290 = vmatprep.mubr.f32.mxu0 %v3604_v23 }
 0x2ee   :  { %3011 = vmatpush1.bf16.msra.mxu1 %v3720_v44  ;;  %3043 = vmatpush1.bf16.msra.mxu0 %v3806_v46 }
 0x2ef   :  { %3013 = vmatprep.subr.bf16.mxu1 %v3724_v45  ;;  %3045 = vmatprep.subr.bf16.mxu0 %v3810_v47 }
 0x2f2   :  { %3015 = vmatpush1.bf16.msra.mxu1 %v3727_v50  ;;  %3047 = vmatpush1.bf16.msra.mxu0 %v3813_v54 }
 0x2f3   :  { %3017 = vmatprep.subr.bf16.mxu1 %v3730_v51  ;;  %3049 = vmatprep.subr.bf16.mxu0 %v3816_v55 }
 0x2f6   :  { %3019 = vmatpush1.bf16.msra.mxu1 %v3733_v56  ;;  %3051 = vmatpush1.bf16.msra.mxu0 %v3819_v0 }
 0x2f7   :  { %3021 = vmatprep.subr.bf16.mxu1 %v3736_v57  ;;  %3053 = vmatprep.subr.bf16.mxu0 %v3822_v1 }
 0x2fa   :  { %3023 = vmatpush1.bf16.msra.mxu1 %v3739_v60  ;;  %3055 = vmatpush1.bf16.msra.mxu0 %v3825_v8 }
 0x2fb   :  { %3025 = vmatprep.subr.bf16.mxu1 %v3743_v63  ;;  %3057 = vmatprep.subr.bf16.mxu0 %v3828_v9 }
 0x2fe   :  { %3027 = vmatpush1.bf16.msra.mxu1 %v3745_v3  ;;  %3059 = vmatpush1.bf16.msra.mxu0 %v3831_v17 }
 0x2ff   :  { %3029 = vmatprep.subr.bf16.mxu1 %v3749_v7  ;;  %3061 = vmatprep.subr.bf16.mxu0 %v3834_v18 }
 0x302   :  { %3031 = vmatpush1.bf16.msra.mxu1 %v3751_v10  ;;  %3063 = vmatpush1.bf16.msra.mxu0 %v3837_v26 }
 0x303   :  { %3033 = vmatprep.subr.bf16.mxu1 %v3755_v13  ;;  %3065 = vmatprep.subr.bf16.mxu0 %v3840_v27 }
 0x306   :  { %3035 = vmatpush1.bf16.msra.mxu1 %v3757_v16  ;;  %3067 = vmatpush1.bf16.msra.mxu0 %v3843_v32 }
 0x307   :  { %3069 = vmatprep.subr.bf16.mxu1 %v3701_v19  ;;  %3101 = vmatprep.subr.bf16.mxu0 %v3793_v31 }
 0x3bc   :  { %v1027_v20 = vpop.f32.mrb[6].mxu1  ;;  %v1098_v22 = vpop.f32.mrb[6].mxu0 }
 0x3bd   :  { %v1107_v24 = vrot.slane %v1027_v20, 7  ;;  %v1029_v25 = vpop.f32.mrb[7].mxu1  ;;  %v1100_v33 = vpop.f32.mrb[7].mxu0  ;;  %v1109_v2 = vrot.slane %v1098_v22, 7 }
 0x3be   :  { %v1108_v34 = vrot.slane %v1029_v25, 7  ;;  %v1110_v58 = vrot.slane %v1100_v33, 7  ;;  %v1139_v33 = vrot.slane %v3892_v5, 7 }
 0x3bf   :  { %v1115_v35 = vadd.f32 %v1107_v24, %v3876_v62  ;;  %v1117_v53 = vadd.f32 %v1109_v2, %v3886_v28  ;;  %v959_v2 = vrot.slane %v3895_v15, %v697_v48 }
 0x3c0   :  { %v1116_v41 = vadd.f32 %v1108_v34, %v3874_v61  ;;  %v1118_v43 = vadd.f32 %v1110_v58, %v3888_v30 }
 0x3c1   :  { %v2683_v49 = vmul.f32 -1.442695, %v1115_v35 }
 0x3c2   :  { %v2684_v52 = vmul.f32 -1.442695, %v1116_v41  ;;  %v2685_v4 = vmul.f32 -1.442695, %v1118_v43 }
 0x3c3   :  { %3463 = vpow2.f32 %v2683_v49 }
 0x3c4   :  { %3465 = vpow2.f32 %v2684_v52 }
 0x3c5   :  { %3467 = vpow2.f32 %v2685_v4 }
 0x3c6   :  { %3469 = vtanh.f32 %v1117_v53 }
 0x3cd   :  { %v3464_v59 = vpop.eup %3463 }
 0x3ce   :  { %v3466_v6 = vpop.eup %3465  ;;  %v1122_v14 = vadd.f32 1.0, %v3464_v59  ;;  %v960_v59 = vsel %vm955_vm5, %v959_v2, 0.0  ;;  %vm2656_vm5 = vcmask 916480  }
 0x3cf   :  { %v1128_v20 = vadd.f32 1.0, %v3466_v6  ;;  %v3468_v24 = vpop.eup %3467 }
 0x3d0   :  { %3471 = vrcp.f32 %v1122_v14  ;;  %v3470_v25 = vpop.eup %3469  ;;  %v1135_v49 = vadd.f32 1.0, %v3468_v24 }
 0x3d1   :  { %3473 = vrcp.f32 %v1128_v20 }
 0x3d2   :  { %3475 = vrcp.f32 %v1135_v49 }
 0x3da   :  { %v3472_v34 = vpop.eup %3471 }
 0x3db   :  { %v3474_v35 = vpop.eup %3473  ;;  %v1142_v41 = vmul.f32 %v3472_v34, %v3470_v25 }
 0x3dc   :  { %v1141_v22 = vmul.f32 %v3474_v35, %v1139_v33  ;;  %v3476_v58 = vpop.eup %3475 }
 0x3de   :  { %v3938_v52 = vadd.f32 %v1142_v41, %v1141_v22 }
 0x3e0   :  { %3477 = vtanh.f32 %v3938_v52 }
 0x3ea   :  { %v3478_v43 = vpop.eup %3477 }
 0x3eb   :  { %v1145_v4 = vmul.f32 %v3478_v43, %v3476_v58 }
 0x3ed   :  { %v1150_v5 = vrot.slane %v1145_v4, %v701_v42  ;;  %v1153_v53 = vrot.slane %v1145_v4, 1 }
 0x3ef   :  { %v3948_v6 = vsel %vm1146_vm6, %v1150_v5, %v960_v59  ;;  %1220 = vmatmul.mubr.f32.vlgmr.msra.gmra.mrb[8].mxu1 %v1153_v53  ;;  %1291 = vmatmul.mubr.f32.vlgmr.msra.gmra.mrb[8].mxu0 %v1153_v53 }
 0x3f0   :  { %3071 = vmatpush1.bf16.msra.mxu1 %v3713_v37  ;;  %3103 = vmatpush1.bf16.msra.mxu0 %v3798_v36 }
 0x3f1   :  { %3073 = vmatprep.subr.bf16.mxu1 %v3715_v39  ;;  %3105 = vmatprep.subr.bf16.mxu0 %v3801_v38 }
 0x3f2   :  { %1413 = vmatprep.mubr.f32.mxu1 %v3604_v23  ;;  %1484 = vmatprep.mubr.f32.mxu0 %v3604_v23 }
 0x3f4   :  { %3075 = vmatpush1.bf16.msra.mxu1 %v3720_v44  ;;  %3107 = vmatpush1.bf16.msra.mxu0 %v3806_v46 }
 0x3f5   :  { %3077 = vmatprep.subr.bf16.mxu1 %v3724_v45  ;;  %3109 = vmatprep.subr.bf16.mxu0 %v3810_v47 }
 0x3f8   :  { %3079 = vmatpush1.bf16.msra.mxu1 %v3727_v50  ;;  %3111 = vmatpush1.bf16.msra.mxu0 %v3813_v54 }
 0x3f9   :  { %3081 = vmatprep.subr.bf16.mxu1 %v3730_v51  ;;  %3113 = vmatprep.subr.bf16.mxu0 %v3816_v55 }
 0x3fc   :  { %3083 = vmatpush1.bf16.msra.mxu1 %v3733_v56  ;;  %3115 = vmatpush1.bf16.msra.mxu0 %v3819_v0 }
 0x3fd   :  { %3085 = vmatprep.subr.bf16.mxu1 %v3736_v57  ;;  %3117 = vmatprep.subr.bf16.mxu0 %v3822_v1 }
 0x400   :  { %3087 = vmatpush1.bf16.msra.mxu1 %v3739_v60  ;;  %3119 = vmatpush1.bf16.msra.mxu0 %v3825_v8 }
 0x401   :  { %3089 = vmatprep.subr.bf16.mxu1 %v3743_v63  ;;  %3121 = vmatprep.subr.bf16.mxu0 %v3828_v9 }
 0x404   :  { %3091 = vmatpush1.bf16.msra.mxu1 %v3745_v3  ;;  %3123 = vmatpush1.bf16.msra.mxu0 %v3831_v17 }
 0x405   :  { %3093 = vmatprep.subr.bf16.mxu1 %v3749_v7  ;;  %3125 = vmatprep.subr.bf16.mxu0 %v3834_v18 }
 0x408   :  { %3095 = vmatpush1.bf16.msra.mxu1 %v3751_v10  ;;  %3127 = vmatpush1.bf16.msra.mxu0 %v3837_v26 }
 0x409   :  { %3097 = vmatprep.subr.bf16.mxu1 %v3755_v13  ;;  %3129 = vmatprep.subr.bf16.mxu0 %v3840_v27 }
 0x40c   :  { %3099 = vmatpush1.bf16.msra.mxu1 %v3757_v16  ;;  %3131 = vmatpush1.bf16.msra.mxu0 %v3843_v32 }
 0x40d   :  { %3133 = vmatprep.subr.bf16.mxu1 %v3701_v19  ;;  %3165 = vmatprep.subr.bf16.mxu0 %v3793_v31 }
 0x4c2   :  { %v1221_v42 = vpop.f32.mrb[8].mxu1  ;;  %v1292_v48 = vpop.f32.mrb[8].mxu0 }
 0x4c3   :  { %v1301_v15 = vrot.slane %v1221_v42, 6  ;;  %v1223_v14 = vpop.f32.mrb[9].mxu1  ;;  %v1294_v20 = vpop.f32.mrb[9].mxu0  ;;  %v1303_v22 = vrot.slane %v1292_v48, 6 }
 0x4c4   :  { %v1302_v24 = vrot.slane %v1223_v14, 6  ;;  %v1304_v41 = vrot.slane %v1294_v20, 6  ;;  %v1333_v14 = vrot.slane %v3938_v52, 7 }
 0x4c5   :  { %v1309_v25 = vadd.f32 %v1301_v15, %v3876_v62  ;;  %v1311_v43 = vadd.f32 %v1303_v22, %v3886_v28 }
 0x4c6   :  { %v1310_v34 = vadd.f32 %v1302_v24, %v3874_v61  ;;  %v1312_v49 = vadd.f32 %v1304_v41, %v3888_v30 }
 0x4c7   :  { %v2686_v33 = vmul.f32 -1.442695, %v1309_v25 }
 0x4c8   :  { %v2687_v35 = vmul.f32 -1.442695, %v1310_v34  ;;  %v2688_v58 = vmul.f32 -1.442695, %v1312_v49 }
 0x4c9   :  { %3479 = vpow2.f32 %v2686_v33 }
 0x4ca   :  { %3481 = vpow2.f32 %v2687_v35 }
 0x4cb   :  { %3483 = vpow2.f32 %v2688_v58 }
 0x4cc   :  { %3485 = vtanh.f32 %v1311_v43 }
 0x4d3   :  { %v3480_v2 = vpop.eup %3479 }
 0x4d4   :  { %v3482_v4 = vpop.eup %3481  ;;  %v1316_v5 = vadd.f32 1.0, %v3480_v2 }
 0x4d5   :  { %v1322_v53 = vadd.f32 1.0, %v3482_v4  ;;  %v3484_v59 = vpop.eup %3483 }
 0x4d6   :  { %3487 = vrcp.f32 %v1316_v5  ;;  %v3486_v42 = vpop.eup %3485  ;;  %v1329_v25 = vadd.f32 1.0, %v3484_v59 }
 0x4d7   :  { %3489 = vrcp.f32 %v1322_v53 }
 0x4d8   :  { %3491 = vrcp.f32 %v1329_v25 }
 0x4e0   :  { %v3488_v15 = vpop.eup %3487 }
 0x4e1   :  { %v3490_v20 = vpop.eup %3489  ;;  %v1336_v24 = vmul.f32 %v3488_v15, %v3486_v42 }
 0x4e2   :  { %v1335_v48 = vmul.f32 %v3490_v20, %v1333_v14  ;;  %v3492_v33 = vpop.eup %3491 }
 0x4e4   :  { %v3989_v34 = vadd.f32 %v1336_v24, %v1335_v48 }
 0x4e6   :  { %3493 = vtanh.f32 %v3989_v34 }
 0x4f0   :  { %v3494_v35 = vpop.eup %3493 }
 0x4f1   :  { %v1339_v41 = vmul.f32 %v3494_v35, %v3492_v33 }
 0x4f3   :  { %v1344_v49 = vrot.slane %v1339_v41, %v705_v11  ;;  %v1347_v22 = vrot.slane %v1339_v41, 2 }
 0x4f5   :  { %1414 = vmatmul.mubr.f32.vlgmr.msra.gmra.mrb[10].mxu1 %v1347_v22  ;;  %1485 = vmatmul.mubr.f32.vlgmr.msra.gmra.mrb[10].mxu0 %v1347_v22  ;;  %v3996_v52 = vsel %vm1340_vm7, %v1344_v49, %v3948_v6 }
 0x4f6   :  { %3135 = vmatpush1.bf16.msra.mxu1 %v3713_v37  ;;  %3167 = vmatpush1.bf16.msra.mxu0 %v3798_v36 }
 0x4f7   :  { %3137 = vmatprep.subr.bf16.mxu1 %v3715_v39  ;;  %3169 = vmatprep.subr.bf16.mxu0 %v3801_v38 }
 0x4f8   :  { %1607 = vmatprep.mubr.f32.mxu1 %v3604_v23  ;;  %1678 = vmatprep.mubr.f32.mxu0 %v3604_v23 }
 0x4fa   :  { %3139 = vmatpush1.bf16.msra.mxu1 %v3720_v44  ;;  %3171 = vmatpush1.bf16.msra.mxu0 %v3806_v46 }
 0x4fb   :  { %3141 = vmatprep.subr.bf16.mxu1 %v3724_v45  ;;  %3173 = vmatprep.subr.bf16.mxu0 %v3810_v47 }
 0x4fe   :  { %3143 = vmatpush1.bf16.msra.mxu1 %v3727_v50  ;;  %3175 = vmatpush1.bf16.msra.mxu0 %v3813_v54 }
 0x4ff   :  { %3145 = vmatprep.subr.bf16.mxu1 %v3730_v51  ;;  %3177 = vmatprep.subr.bf16.mxu0 %v3816_v55 }
 0x502   :  { %3147 = vmatpush1.bf16.msra.mxu1 %v3733_v56  ;;  %3179 = vmatpush1.bf16.msra.mxu0 %v3819_v0 }
 0x503   :  { %3149 = vmatprep.subr.bf16.mxu1 %v3736_v57  ;;  %3181 = vmatprep.subr.bf16.mxu0 %v3822_v1 }
 0x506   :  { %3151 = vmatpush1.bf16.msra.mxu1 %v3739_v60  ;;  %3183 = vmatpush1.bf16.msra.mxu0 %v3825_v8 }
 0x507   :  { %3153 = vmatprep.subr.bf16.mxu1 %v3743_v63  ;;  %3185 = vmatprep.subr.bf16.mxu0 %v3828_v9 }
 0x50a   :  { %3155 = vmatpush1.bf16.msra.mxu1 %v3745_v3  ;;  %3187 = vmatpush1.bf16.msra.mxu0 %v3831_v17 }
 0x50b   :  { %3157 = vmatprep.subr.bf16.mxu1 %v3749_v7  ;;  %3189 = vmatprep.subr.bf16.mxu0 %v3834_v18 }
 0x50e   :  { %3159 = vmatpush1.bf16.msra.mxu1 %v3751_v10  ;;  %3191 = vmatpush1.bf16.msra.mxu0 %v3837_v26 }
 0x50f   :  { %3161 = vmatprep.subr.bf16.mxu1 %v3755_v13  ;;  %3193 = vmatprep.subr.bf16.mxu0 %v3840_v27 }
 0x512   :  { %3163 = vmatpush1.bf16.msra.mxu1 %v3757_v16  ;;  %3195 = vmatpush1.bf16.msra.mxu0 %v3843_v32 }
 0x513   :  { %3197 = vmatprep.subr.bf16.mxu1 %v3701_v19  ;;  %3229 = vmatprep.subr.bf16.mxu0 %v3793_v31 }
 0x5c8   :  { %v1415_v11 = vpop.f32.mrb[10].mxu1  ;;  %v1486_v6 = vpop.f32.mrb[10].mxu0 }
 0x5c9   :  { %v1495_v58 = vrot.slane %v1415_v11, 5  ;;  %v1417_v43 = vpop.f32.mrb[11].mxu1  ;;  %v1488_v2 = vpop.f32.mrb[11].mxu0  ;;  %v1497_v20 = vrot.slane %v1486_v6, 5 }
 0x5ca   :  { %v1496_v4 = vrot.slane %v1417_v43, 5  ;;  %v1498_v15 = vrot.slane %v1488_v2, 5 }
 0x5cb   :  { %v1503_v5 = vadd.f32 %v1495_v58, %v3876_v62  ;;  %v1505_v25 = vadd.f32 %v1497_v20, %v3886_v28  ;;  %v1527_v58 = vrot.slane %v3989_v34, 7 }
 0x5cc   :  { %v1504_v53 = vadd.f32 %v1496_v4, %v3874_v61  ;;  %v1506_v14 = vadd.f32 %v1498_v15, %v3888_v30 }
 0x5cd   :  { %v2689_v59 = vmul.f32 -1.442695, %v1503_v5 }
 0x5ce   :  { %v2690_v42 = vmul.f32 -1.442695, %v1504_v53  ;;  %v2691_v24 = vmul.f32 -1.442695, %v1506_v14 }
 0x5cf   :  { %3495 = vpow2.f32 %v2689_v59 }
 0x5d0   :  { %3497 = vpow2.f32 %v2690_v42 }
 0x5d1   :  { %3499 = vpow2.f32 %v2691_v24 }
 0x5d2   :  { %3501 = vtanh.f32 %v1505_v25 }
 0x5d9   :  { %v3496_v48 = vpop.eup %3495 }
 0x5da   :  { %v3498_v33 = vpop.eup %3497  ;;  %v1510_v35 = vadd.f32 1.0, %v3496_v48 }
 0x5db   :  { %v1516_v41 = vadd.f32 1.0, %v3498_v33  ;;  %v3500_v49 = vpop.eup %3499 }
 0x5dc   :  { %3503 = vrcp.f32 %v1510_v35  ;;  %v3502_v22 = vpop.eup %3501  ;;  %v1523_v4 = vadd.f32 1.0, %v3500_v49 }
 0x5dd   :  { %3505 = vrcp.f32 %v1516_v41 }
 0x5de   :  { %3507 = vrcp.f32 %v1523_v4 }
 0x5e6   :  { %v3504_v11 = vpop.eup %3503 }
 0x5e7   :  { %v3506_v43 = vpop.eup %3505  ;;  %v1530_v2 = vmul.f32 %v3504_v11, %v3502_v22 }
 0x5e8   :  { %v1529_v6 = vmul.f32 %v3506_v43, %v1527_v58  ;;  %v3508_v53 = vpop.eup %3507 }
 0x5ea   :  { %v4037_v5 = vadd.f32 %v1530_v2, %v1529_v6 }
 0x5ec   :  { %3509 = vtanh.f32 %v4037_v5 }
 0x5f6   :  { %v3510_v59 = vpop.eup %3509 }
 0x5f7   :  { %v1533_v42 = vmul.f32 %v3510_v59, %v3508_v53 }
 0x5f9   :  { %v1538_v15 = vrot.slane %v1533_v42, %v709_v12  ;;  %v1541_v14 = vrot.slane %v1533_v42, 3 }
 0x5fb   :  { %1608 = vmatmul.mubr.f32.vlgmr.msra.gmra.mrb[12].mxu1 %v1541_v14  ;;  %1679 = vmatmul.mubr.f32.vlgmr.msra.gmra.mrb[12].mxu0 %v1541_v14  ;;  %v4044_v34 = vsel %vm1534_vm8, %v1538_v15, %v3996_v52 }
 0x5fc   :  { %3199 = vmatpush1.bf16.msra.mxu1 %v3713_v37  ;;  %3231 = vmatpush1.bf16.msra.mxu0 %v3798_v36 }
 0x5fd   :  { %3201 = vmatprep.subr.bf16.mxu1 %v3715_v39  ;;  %3233 = vmatprep.subr.bf16.mxu0 %v3801_v38 }
 0x5fe   :  { %1801 = vmatprep.mubr.f32.mxu1 %v3604_v23  ;;  %1872 = vmatprep.mubr.f32.mxu0 %v3604_v23 }
 0x600   :  { %3203 = vmatpush1.bf16.msra.mxu1 %v3720_v44  ;;  %3235 = vmatpush1.bf16.msra.mxu0 %v3806_v46 }
 0x601   :  { %3205 = vmatprep.subr.bf16.mxu1 %v3724_v45  ;;  %3237 = vmatprep.subr.bf16.mxu0 %v3810_v47 }
 0x604   :  { %3207 = vmatpush1.bf16.msra.mxu1 %v3727_v50  ;;  %3239 = vmatpush1.bf16.msra.mxu0 %v3813_v54 }
 0x605   :  { %3209 = vmatprep.subr.bf16.mxu1 %v3730_v51  ;;  %3241 = vmatprep.subr.bf16.mxu0 %v3816_v55 }
 0x608   :  { %3211 = vmatpush1.bf16.msra.mxu1 %v3733_v56  ;;  %3243 = vmatpush1.bf16.msra.mxu0 %v3819_v0 }
 0x609   :  { %3213 = vmatprep.subr.bf16.mxu1 %v3736_v57  ;;  %3245 = vmatprep.subr.bf16.mxu0 %v3822_v1 }
 0x60c   :  { %3215 = vmatpush1.bf16.msra.mxu1 %v3739_v60  ;;  %3247 = vmatpush1.bf16.msra.mxu0 %v3825_v8 }
 0x60d   :  { %3217 = vmatprep.subr.bf16.mxu1 %v3743_v63  ;;  %3249 = vmatprep.subr.bf16.mxu0 %v3828_v9 }
 0x610   :  { %3219 = vmatpush1.bf16.msra.mxu1 %v3745_v3  ;;  %3251 = vmatpush1.bf16.msra.mxu0 %v3831_v17 }
 0x611   :  { %3221 = vmatprep.subr.bf16.mxu1 %v3749_v7  ;;  %3253 = vmatprep.subr.bf16.mxu0 %v3834_v18 }
 0x614   :  { %3223 = vmatpush1.bf16.msra.mxu1 %v3751_v10  ;;  %3255 = vmatpush1.bf16.msra.mxu0 %v3837_v26 }
 0x615   :  { %3225 = vmatprep.subr.bf16.mxu1 %v3755_v13  ;;  %3257 = vmatprep.subr.bf16.mxu0 %v3840_v27 }
 0x618   :  { %3227 = vmatpush1.bf16.msra.mxu1 %v3757_v16  ;;  %3259 = vmatpush1.bf16.msra.mxu0 %v3843_v32 }
 0x619   :  { %3261 = vmatprep.subr.bf16.mxu1 %v3701_v19  ;;  %3293 = vmatprep.subr.bf16.mxu0 %v3793_v31 }
 0x6ce   :  { %v1609_v12 = vpop.f32.mrb[12].mxu1  ;;  %v1680_v52 = vpop.f32.mrb[12].mxu0 }
 0x6cf   :  { %v1689_v20 = vrot.slane %v1609_v12, 4  ;;  %v1611_v24 = vpop.f32.mrb[13].mxu1  ;;  %v1682_v25 = vpop.f32.mrb[13].mxu0  ;;  %v1691_v58 = vrot.slane %v1680_v52, 4  ;;  %v1721_v12 = vrot.slane %v4037_v5, 7 }
 0x6d0   :  { %v1690_v48 = vrot.slane %v1611_v24, 4  ;;  %v1692_v22 = vrot.slane %v1682_v25, 4 }
 0x6d1   :  { %v1697_v33 = vadd.f32 %v1689_v20, %v3876_v62  ;;  %v1699_v2 = vadd.f32 %v1691_v58, %v3886_v28 }
 0x6d2   :  { %v1698_v35 = vadd.f32 %v1690_v48, %v3874_v61  ;;  %v1700_v11 = vadd.f32 %v1692_v22, %v3888_v30 }
 0x6d3   :  { %v2692_v41 = vmul.f32 -1.442695, %v1697_v33 }
 0x6d4   :  { %v2693_v49 = vmul.f32 -1.442695, %v1698_v35  ;;  %v2694_v43 = vmul.f32 -1.442695, %v1700_v11  ;;  %v1731_v35 = vsub.s32 4, %v3866_v40 }
 0x6d5   :  { %3511 = vpow2.f32 %v2692_v41 }
 0x6d6   :  { %3513 = vpow2.f32 %v2693_v49 }
 0x6d7   :  { %3515 = vpow2.f32 %v2694_v43 }
 0x6d8   :  { %3517 = vtanh.f32 %v1699_v2 }
 0x6df   :  { %v3512_v4 = vpop.eup %3511 }
 0x6e0   :  { %v3514_v6 = vpop.eup %3513  ;;  %v1704_v53 = vadd.f32 1.0, %v3512_v4 }
 0x6e1   :  { %v1710_v59 = vadd.f32 1.0, %v3514_v6  ;;  %v3516_v42 = vpop.eup %3515 }
 0x6e2   :  { %3519 = vrcp.f32 %v1704_v53  ;;  %v3518_v15 = vpop.eup %3517  ;;  %v1717_v25 = vadd.f32 1.0, %v3516_v42 }
 0x6e3   :  { %3521 = vrcp.f32 %v1710_v59 }
 0x6e4   :  { %3523 = vrcp.f32 %v1717_v25 }
 0x6ec   :  { %v3520_v14 = vpop.eup %3519 }
 0x6ed   :  { %v3522_v20 = vpop.eup %3521  ;;  %v1724_v24 = vmul.f32 %v3520_v14, %v3518_v15 }
 0x6ee   :  { %v1723_v52 = vmul.f32 %v3522_v20, %v1721_v12  ;;  %v3524_v33 = vpop.eup %3523 }
 0x6f0   :  { %v4085_v48 = vadd.f32 %v1724_v24, %v1723_v52 }
 0x6f2   :  { %3525 = vtanh.f32 %v4085_v48 }
 0x6fc   :  { %v3526_v41 = vpop.eup %3525 }
 0x6fd   :  { %v1727_v49 = vmul.f32 %v3526_v41, %v3524_v33 }
 0x6ff   :  { %v1732_v22 = vrot.slane %v1727_v49, %v1731_v35  ;;  %v1735_v11 = vrot.slane %v1727_v49, 4 }
 0x701   :  { %1802 = vmatmul.mubr.f32.vlgmr.msra.gmra.mrb[14].mxu1 %v1735_v11  ;;  %1873 = vmatmul.mubr.f32.vlgmr.msra.gmra.mrb[14].mxu0 %v1735_v11  ;;  %v4091_v5 = vsel %vm1728_vm9, %v1732_v22, %v4044_v34  ;;  %v1915_v22 = vrot.slane %v4085_v48, 7 }
 0x702   :  { %3263 = vmatpush1.bf16.msra.mxu1 %v3713_v37  ;;  %3295 = vmatpush1.bf16.msra.mxu0 %v3798_v36 }
 0x703   :  { %3265 = vmatprep.subr.bf16.mxu1 %v3715_v39  ;;  %3297 = vmatprep.subr.bf16.mxu0 %v3801_v38 }
 0x704   :  { %1995 = vmatprep.mubr.f32.mxu1 %v3604_v23  ;;  %2066 = vmatprep.mubr.f32.mxu0 %v3604_v23 }
 0x706   :  { %3267 = vmatpush1.bf16.msra.mxu1 %v3720_v44  ;;  %3299 = vmatpush1.bf16.msra.mxu0 %v3806_v46 }
 0x707   :  { %3269 = vmatprep.subr.bf16.mxu1 %v3724_v45  ;;  %3301 = vmatprep.subr.bf16.mxu0 %v3810_v47 }
 0x70a   :  { %3271 = vmatpush1.bf16.msra.mxu1 %v3727_v50  ;;  %3303 = vmatpush1.bf16.msra.mxu0 %v3813_v54 }
 0x70b   :  { %3273 = vmatprep.subr.bf16.mxu1 %v3730_v51  ;;  %3305 = vmatprep.subr.bf16.mxu0 %v3816_v55 }
 0x70e   :  { %3275 = vmatpush1.bf16.msra.mxu1 %v3733_v56  ;;  %3307 = vmatpush1.bf16.msra.mxu0 %v3819_v0 }
 0x70f   :  { %3277 = vmatprep.subr.bf16.mxu1 %v3736_v57  ;;  %3309 = vmatprep.subr.bf16.mxu0 %v3822_v1 }
 0x712   :  { %3279 = vmatpush1.bf16.msra.mxu1 %v3739_v60  ;;  %3311 = vmatpush1.bf16.msra.mxu0 %v3825_v8 }
 0x713   :  { %3281 = vmatprep.subr.bf16.mxu1 %v3743_v63  ;;  %3313 = vmatprep.subr.bf16.mxu0 %v3828_v9 }
 0x716   :  { %3283 = vmatpush1.bf16.msra.mxu1 %v3745_v3  ;;  %3315 = vmatpush1.bf16.msra.mxu0 %v3831_v17 }
 0x717   :  { %3285 = vmatprep.subr.bf16.mxu1 %v3749_v7  ;;  %3317 = vmatprep.subr.bf16.mxu0 %v3834_v18 }
 0x71a   :  { %3287 = vmatpush1.bf16.msra.mxu1 %v3751_v10  ;;  %3319 = vmatpush1.bf16.msra.mxu0 %v3837_v26 }
 0x71b   :  { %3289 = vmatprep.subr.bf16.mxu1 %v3755_v13  ;;  %3321 = vmatprep.subr.bf16.mxu0 %v3840_v27 }
 0x71e   :  { %3291 = vmatpush1.bf16.msra.mxu1 %v3757_v16  ;;  %3323 = vmatpush1.bf16.msra.mxu0 %v3843_v32 }
 0x71f   :  { %3325 = vmatprep.subr.bf16.mxu1 %v3701_v19  ;;  %3357 = vmatprep.subr.bf16.mxu0 %v3793_v31 }
 0x7d4   :  { %v1803_v34 = vpop.f32.mrb[14].mxu1  ;;  %v1874_v58 = vpop.f32.mrb[14].mxu0 }
 0x7d5   :  { %v1883_v43 = vrot.slane %v1803_v34, 3  ;;  %v1805_v2 = vpop.f32.mrb[15].mxu1  ;;  %v1876_v4 = vpop.f32.mrb[15].mxu0  ;;  %v1885_v19 = vrot.slane %v1874_v58, 3 }
 0x7d6   :  { %v1884_v6 = vrot.slane %v1805_v2, 3  ;;  %v1886_v14 = vrot.slane %v1876_v4, 3 }
 0x7d7   :  { %v1891_v53 = vadd.f32 %v1883_v43, %v3876_v62  ;;  %v1893_v31 = vadd.f32 %v1885_v19, %v3886_v28  ;;  %v2429_v19 = vld [vmem:[%s4342_s5 + $0x60] sm:$0xff] }
 0x7d8   :  { %v1892_v59 = vadd.f32 %v1884_v6, %v3874_v61  ;;  %v1894_v12 = vadd.f32 %v1886_v14, %v3888_v30  ;;  %v1925_v6 = vsub.s32 5, %v3866_v40 }
 0x7d9   :  { %v2695_v42 = vmul.f32 -1.442695, %v1891_v53 }
 0x7da   :  { %v2696_v15 = vmul.f32 -1.442695, %v1892_v59  ;;  %v2697_v20 = vmul.f32 -1.442695, %v1894_v12 }
 0x7db   :  { %3527 = vpow2.f32 %v2695_v42 }
 0x7dc   :  { %3529 = vpow2.f32 %v2696_v15 }
 0x7dd   :  { %3531 = vpow2.f32 %v2697_v20 }
 0x7de   :  { %3533 = vtanh.f32 %v1893_v31 }
 0x7e5   :  { %v3528_v24 = vpop.eup %3527 }
 0x7e6   :  { %v3530_v25 = vpop.eup %3529  ;;  %v1898_v52 = vadd.f32 1.0, %v3528_v24  ;;  %v2316_v24 = vld [vmem:[%s4342_s5 + $0xb8] sm:$0xff] }
 0x7e7   :  { %v1904_v33 = vadd.f32 1.0, %v3530_v25  ;;  %v3532_v35 = vpop.eup %3531  ;;  %v2317_v25 = vld [vmem:[%s4342_s5 + $0xc0] sm:$0xff] }
 0x7e8   :  { %3535 = vrcp.f32 %v1898_v52  ;;  %v3534_v41 = vpop.eup %3533  ;;  %v1911_v43 = vadd.f32 1.0, %v3532_v35  ;;  %v3389_v52 = vpack.c.bf16 %v2317_v25, %v2316_v24  ;;  %v2318_v35 = vld [vmem:[%s4342_s5 + $0xc8] sm:$0xff]  ;;  %v2313_v25 = vsub.s32 7, %v3866_v40 }
 0x7e9   :  { %3537 = vrcp.f32 %v1904_v33  ;;  %v3606_v33 = vmov 0.0|0.0  }
 0x7ea   :  { %3539 = vrcp.f32 %v1911_v43  ;;  %v2322_v43 = vld [vmem:[%s4342_s5 + $0xe8] sm:$0xff] }
 0x7f2   :  { %v3536_v49 = vpop.eup %3535 }
 0x7f3   :  { %v3538_v11 = vpop.eup %3537  ;;  %v1918_v34 = vmul.f32 %v3536_v49, %v3534_v41  ;;  %v2319_v41 = vld [vmem:[%s4342_s5 + $0xd0] sm:$0xff] }
 0x7f4   :  { %v1917_v58 = vmul.f32 %v3538_v11, %v1915_v22  ;;  %v3540_v4 = vpop.eup %3539  ;;  %v3392_v49 = vpack.c.bf16 %v2319_v41, %v2318_v35  ;;  %v2320_v22 = vld [vmem:[%s4342_s5 + $0xd8] sm:$0xff]  ;;  %v2321_v11 = vld [vmem:[%s4342_s5 + $0xe0] sm:$0xff] }
 0x7f6   :  { %v4132_v2 = vadd.f32 %v1918_v34, %v1917_v58  ;;  %v3395_v34 = vpack.c.bf16 %v2321_v11, %v2320_v22  ;;  %v2323_v58 = vld [vmem:[%s4342_s5 + $0xf0] sm:$0xff]  ;;  %v2522_v22 = vld [vmem:[%s4342_s5 + $0x78] sm:$0xff]  ;;  %v2523_v11 = vld [vmem:[%s4342_s5 + $0x80] sm:$0xff] }
 0x7f8   :  { %3541 = vtanh.f32 %v4132_v2 }
 0x802   :  { %v3542_v53 = vpop.eup %3541 }
 0x803   :  { %v1921_v59 = vmul.f32 %v3542_v53, %v3540_v4  ;;  %v2324_v4 = vld [vmem:[%s4342_s5 + $0xf8] sm:$0xff] }
 0x805   :  { %v1926_v42 = vrot.slane %v1921_v59, %v1925_v6  ;;  %v1929_v15 = vrot.slane %v1921_v59, 5  ;;  %v2325_v6 = vld [vmem:[%s4342_s5 + $0x100] sm:$0xff]  ;;  %v2326_v59 = vld [vmem:[%s4342_s5 + $0x108] sm:$0xff] }
 0x806   :  { %v3401_v53 = vpack.c.bf16 %v2325_v6, %v2324_v4  ;;  %v2704_v4 = vld [vmem:[%s4342_s5 + $0x138] ss:$0 sm:$0xff] }
 0x807   :  { %1996 = vmatmul.mubr.f32.vlgmr.msra.gmra.mrb[16].mxu1 %v1929_v15  ;;  %2067 = vmatmul.mubr.f32.vlgmr.msra.gmra.mrb[16].mxu0 %v1929_v15  ;;  %v4138_v48 = vsel %vm1922_vm10, %v1926_v42, %v4091_v5  ;;  %v2327_v42 = vld [vmem:[%s4342_s5 + $0x110] sm:$0xff] }
 0x808   :  { %3327 = vmatpush1.bf16.msra.mxu1 %v3713_v37  ;;  %3359 = vmatpush1.bf16.msra.mxu0 %v3798_v36  ;;  %v3404_v15 = vpack.c.bf16 %v2327_v42, %v2326_v59 }
 0x809   :  { %3329 = vmatprep.subr.bf16.mxu1 %v3715_v39  ;;  %3361 = vmatprep.subr.bf16.mxu0 %v3801_v38 }
 0x80a   :  { %2189 = vmatprep.mubr.f32.mxu1 %v3604_v23  ;;  %2260 = vmatprep.mubr.f32.mxu0 %v3604_v23 }
 0x80c   :  { %3331 = vmatpush1.bf16.msra.mxu1 %v3720_v44  ;;  %3363 = vmatpush1.bf16.msra.mxu0 %v3806_v46 }
 0x80d   :  { %3333 = vmatprep.subr.bf16.mxu1 %v3724_v45  ;;  %3365 = vmatprep.subr.bf16.mxu0 %v3810_v47 }
 0x810   :  { %3335 = vmatpush1.bf16.msra.mxu1 %v3727_v50  ;;  %3367 = vmatpush1.bf16.msra.mxu0 %v3813_v54 }
 0x811   :  { %3337 = vmatprep.subr.bf16.mxu1 %v3730_v51  ;;  %3369 = vmatprep.subr.bf16.mxu0 %v3816_v55 }
 0x814   :  { %3339 = vmatpush1.bf16.msra.mxu1 %v3733_v56  ;;  %3371 = vmatpush1.bf16.msra.mxu0 %v3819_v0 }
 0x815   :  { %3341 = vmatprep.subr.bf16.mxu1 %v3736_v57  ;;  %3373 = vmatprep.subr.bf16.mxu0 %v3822_v1  ;;  %v2109_v1 = vrot.slane %v4132_v2, 7  ;;  %v3398_v2 = vpack.c.bf16 %v2323_v58, %v2322_v43  ;;  %v2525_v43 = vld [vmem:[%s4342_s5 + $0x90] sm:$0xff]  ;;  %v2526_v58 = vld [vmem:[%s4342_s5 + $0x98] sm:$0xff] }
 0x818   :  { %3343 = vmatpush1.bf16.msra.mxu1 %v3739_v60  ;;  %3375 = vmatpush1.bf16.msra.mxu0 %v3825_v8 }
 0x819   :  { %3345 = vmatprep.subr.bf16.mxu1 %v3743_v63  ;;  %3377 = vmatprep.subr.bf16.mxu0 %v3828_v9 }
 0x81c   :  { %3347 = vmatpush1.bf16.msra.mxu1 %v3745_v3  ;;  %3379 = vmatpush1.bf16.msra.mxu0 %v3831_v17 }
 0x81d   :  { %3349 = vmatprep.subr.bf16.mxu1 %v3749_v7  ;;  %3381 = vmatprep.subr.bf16.mxu0 %v3834_v18 }
 0x820   :  { %3351 = vmatpush1.bf16.msra.mxu1 %v3751_v10  ;;  %3383 = vmatpush1.bf16.msra.mxu0 %v3837_v26 }
 0x821   :  { %3353 = vmatprep.subr.bf16.mxu1 %v3755_v13  ;;  %3385 = vmatprep.subr.bf16.mxu0 %v3840_v27 }
 0x824   :  { %3355 = vmatpush1.bf16.msra.mxu1 %v3757_v16  ;;  %3387 = vmatpush1.bf16.msra.mxu0 %v3843_v32  ;;  %v2119_v32 = vsub.s32 6, %v3866_v40  ;;  %v2524_v40 = vld [vmem:[%s4342_s5 + $0x88] sm:$0xff] }
 0x825   :  { %2820 = vmatprep.subr.mxu0 %v3604_v23  ;;  %3388 = vmatprep.subr.bf16.mxu1 %v3606_v33 }
 0x8da   :  { %v1997_v37 = vpop.f32.mrb[16].mxu1  ;;  %v2068_v39 = vpop.f32.mrb[16].mxu0 }
 0x8db   :  { %v2077_v44 = vrot.slane %v1997_v37, 2  ;;  %v1999_v45 = vpop.f32.mrb[17].mxu1  ;;  %v2070_v50 = vpop.f32.mrb[17].mxu0  ;;  %v2079_v10 = vrot.slane %v2068_v39, 2  ;;  %v2329_v37 = vld [vmem:[%s4342_s5 + $0x120] sm:$0xff] }
 0x8dc   :  { %v2078_v51 = vrot.slane %v1999_v45, 2  ;;  %v2080_v3 = vrot.slane %v2070_v50, 2  ;;  %v2331_v45 = vld [vmem:[%s4342_s5 + $0x130] sm:$0xff] }
 0x8dd   :  { %v2085_v56 = vadd.f32 %v2077_v44, %v3876_v62  ;;  %v2087_v16 = vadd.f32 %v2079_v10, %v3886_v28  ;;  %v2330_v44 = vld [vmem:[%s4342_s5 + $0x128] sm:$0xff] }
 0x8de   :  { %v2086_v57 = vadd.f32 %v2078_v51, %v3874_v61  ;;  %v2088_v7 = vadd.f32 %v2080_v3, %v3888_v30  ;;  %v3410_v50 = vpack.c.bf16 %v2331_v45, %v2330_v44  ;;  %v2407_v51 = vld [vmem:[%s4340_s3] sm:$0xff] }
 0x8df   :  { %v2698_v60 = vmul.f32 -1.442695, %v2085_v56  ;;  %2420 = vrot.lane.b32.xlu1 %v2407_v51, %s3607_s20  ;;  %2411 = vrot.lane.b32.xlu0 %v2407_v51, %s3608_s21  ;;  %v2705_v51 = vld [vmem:[%s4342_s5 + $0x68] ss:$0 sm:$0xff]  ;;  %s3614_s20 = smov 80  }
 0x8e0   :  { %v2699_v63 = vmul.f32 -1.442695, %v2086_v57  ;;  %v2700_v13 = vmul.f32 -1.442695, %v2088_v7 }
 0x8e1   :  { %3543 = vpow2.f32 %v2698_v60 }
 0x8e2   :  { %3545 = vpow2.f32 %v2699_v63 }
 0x8e3   :  { %3547 = vpow2.f32 %v2700_v13 }
 0x8e4   :  { %3549 = vtanh.f32 %v2087_v16 }
 0x8eb   :  { %v3544_v36 = vpop.eup %3543 }
 0x8ec   :  { %v3546_v38 = vpop.eup %3545  ;;  %v2092_v46 = vadd.f32 1.0, %v3544_v36 }
 0x8ed   :  { %v2098_v47 = vadd.f32 1.0, %v3546_v38  ;;  %v3548_v54 = vpop.eup %3547 }
 0x8ee   :  { %3551 = vrcp.f32 %v2092_v46  ;;  %v3550_v55 = vpop.eup %3549  ;;  %v2105_v17 = vadd.f32 1.0, %v3548_v54 }
 0x8ef   :  { %3553 = vrcp.f32 %v2098_v47 }
 0x8f0   :  { %3555 = vrcp.f32 %v2105_v17 }
 0x8f8   :  { %v3552_v0 = vpop.eup %3551 }
 0x8f9   :  { %v3554_v8 = vpop.eup %3553  ;;  %v2112_v9 = vmul.f32 %v3552_v0, %v3550_v55 }
 0x8fa   :  { %v2111_v18 = vmul.f32 %v3554_v8, %v2109_v1  ;;  %v3556_v27 = vpop.eup %3555 }
 0x8fc   :  { %v4178_v26 = vadd.f32 %v2112_v9, %v2111_v18 }
 0x8fe   :  { %3557 = vtanh.f32 %v4178_v26 }
 0x908   :  { %v3558_v5 = vpop.eup %3557 }
 0x909   :  { %v2115_v14 = vmul.f32 %v3558_v5, %v3556_v27 }
 0x90b   :  { %v2123_v12 = vrot.slane %v2115_v14, 6  ;;  %v2120_v20 = vrot.slane %v2115_v14, %v2119_v32  ;;  %v2303_v14 = vrot.slane %v4178_v26, 7  ;;  %v2521_v26 = vld [vmem:[%s4342_s5 + $0x70] sm:$0xff] }
 0x90d   :  { %2190 = vmatmul.mubr.f32.vlgmr.msra.gmra.mrb[18].mxu1 %v2123_v12  ;;  %2261 = vmatmul.mubr.f32.vlgmr.msra.gmra.mrb[18].mxu0 %v2123_v12  ;;  %v4187_v31 = vsel %vm2116_vm11, %v2120_v20, %v4138_v48  ;;  %v2328_v48 = vld [vmem:[%s4342_s5 + $0x118] sm:$0xff] }
 0x90e   :  { %2821 = vmatpush3.msra.mxu0 %v2429_v19  ;;  %2822 = vmatprep.mubr.msk.f32.mxu0 %vm3605_vm12, %v3604_v23  ;;  %v3407_v39 = vpack.c.bf16 %v2329_v37, %v2328_v48  ;;  %v2528_v48 = vld [vmem:[%s4342_s5 + $0xa8] sm:$0xff] }
 0x90f   :  { %2817 = vmatprep.mubr.msk.f32.mxu1 %vm3605_vm12, %v3604_v23  ;;  %3412 = vmatprep.subr.bf16.mxu0 %v3606_v33 }
 0x910   :  { %3390 = vmatpush3.bf16.msra.mxu1 %v3389_v52 }
 0x911   :  { %2823 = vmatmul.mubr.msk.f32.vlgmr.msra.gmra.mrb[20].mxu0 %vm393_vm4, %v3783_v21  ;;  %3391 = vmatprep.subr.bf16.mxu1 %v3606_v33 }
 0x912   :  { %2825 = vmatprep.mubr.msk.f32.mxu0 %vm3605_vm12, %v3604_v23 }
 0x914   :  { %3393 = vmatpush3.bf16.msra.mxu1 %v3392_v49 }
 0x915   :  { %2826 = vmatmul.mubr.msk.f32.gmra.mrb[22].mxu0 %vm393_vm4, %v3791_v29  ;;  %3394 = vmatprep.subr.bf16.mxu1 %v3606_v33 }
 0x916   :  { %2828 = vmatprep.mubr.msk.f32.mxu0 %vm3605_vm12, %v3604_v23 }
 0x918   :  { %3396 = vmatpush3.bf16.msra.mxu1 %v3395_v34  ;;  %v3413_v34 = vpack.c.bf16 %v2522_v22, %v2521_v26 }
 0x919   :  { %3397 = vmatprep.subr.bf16.mxu1 %v3606_v33 }
 0x91a   :  { %3414 = vmatpush3.bf16.msra.mxu0 %v3413_v34 }
 0x91b   :  { %3415 = vmatprep.subr.bf16.mxu0 %v3606_v33 }
 0x91c   :  { %3399 = vmatpush3.bf16.msra.mxu1 %v3398_v2  ;;  %v3419_v2 = vpack.c.bf16 %v2526_v58, %v2525_v43 }
 0x91d   :  { %3400 = vmatprep.subr.bf16.mxu1 %v3606_v33 }
 0x920   :  { %3402 = vmatpush3.bf16.msra.mxu1 %v3401_v53 }
 0x921   :  { %3403 = vmatprep.subr.bf16.mxu1 %v3606_v33 }
 0x924   :  { %3405 = vmatpush3.bf16.msra.mxu1 %v3404_v15  ;;  %v2527_v15 = vld [vmem:[%s4342_s5 + $0xa0] sm:$0xff] }
 0x925   :  { %3406 = vmatprep.subr.bf16.mxu1 %v3606_v33 }
 0x928   :  { %3408 = vmatpush3.bf16.msra.mxu1 %v3407_v39 }
 0x929   :  { %3409 = vmatprep.subr.bf16.mxu1 %v3606_v33 }
 0x92c   :  { %3411 = vmatpush3.bf16.msra.mxu1 %v3410_v50 }
 0x951   :  { %v2421_v37 = vpop.permute.xlu1 %2420  ;;  %v2412_v39 = vpop.permute.xlu0 %2411 }
 0x9e0   :  { %v2191_v56 = vpop.f32.mrb[18].mxu1  ;;  %v2262_v57 = vpop.f32.mrb[18].mxu0 }
 0x9e1   :  { %v2271_v60 = vrot.slane %v2191_v56, 1  ;;  %v2193_v63 = vpop.f32.mrb[19].mxu1  ;;  %v2264_v3 = vpop.f32.mrb[19].mxu0  ;;  %v2273_v1 = vrot.slane %v2262_v57, 1 }
 0x9e2   :  { %v2272_v7 = vrot.slane %v2193_v63, 1  ;;  %v2274_v47 = vrot.slane %v2264_v3, 1 }
 0x9e3   :  { %v2279_v10 = vadd.f32 %v2271_v60, %v3876_v62  ;;  %v2281_v9 = vadd.f32 %v2273_v1, %v3886_v28 }
 0x9e4   :  { %v2280_v13 = vadd.f32 %v2272_v7, %v3874_v61  ;;  %v4264_v16 = vpop.f32.mrb[20].mxu0  ;;  %v2282_v0 = vadd.f32 %v2274_v47, %v3888_v30 }
 0x9e5   :  { %v2701_v36 = vmul.f32 -1.442695, %v2279_v10  ;;  %v2824_v38 = vpop.f32.mrb[21].mxu0  ;;  %v2505_v57 = vadd.f32 %v2705_v51, %v4264_v16  ;;  %v2709_v16 = vld [vmem:[%s4342_s5 + $0xb0] ss:$0 sm:$0xff] }
 0x9e6   :  { %v2702_v46 = vmul.f32 -1.442695, %v2280_v13  ;;  %v2703_v8 = vmul.f32 -1.442695, %v2282_v0 }
 0x9e7   :  { %3559 = vpow2.f32 %v2701_v36 }
 0x9e8   :  { %3561 = vpow2.f32 %v2702_v46  ;;  %v4266_v54 = vpop.f32.mrb[22].mxu0 }
 0x9e9   :  { %v2827_v55 = vpop.f32.mrb[23].mxu0  ;;  %3563 = vpow2.f32 %v2703_v8  ;;  %v2510_v63 = vadd.f32 %v2705_v51, %v4266_v54 }
 0x9ea   :  { %3565 = vtanh.f32 %v2281_v9 }
 0x9eb   :  { %v2519_v3 = vmax.f32 %v2510_v63, 0.0 }
 0x9f1   :  { %v3560_v62 = vpop.eup %3559 }
 0x9f2   :  { %v3562_v17 = vpop.eup %3561  ;;  %v2286_v61 = vadd.f32 1.0, %v3560_v62 }
 0x9f3   :  { %v2292_v18 = vadd.f32 1.0, %v3562_v17  ;;  %v3564_v27 = vpop.eup %3563 }
 0x9f4   :  { %3567 = vrcp.f32 %v2286_v61  ;;  %v3566_v32 = vpop.eup %3565  ;;  %v2299_v30 = vadd.f32 1.0, %v3564_v27 }
 0x9f5   :  { %3569 = vrcp.f32 %v2292_v18 }
 0x9f6   :  { %3571 = vrcp.f32 %v2299_v30 }
 0x9fe   :  { %v3568_v5 = vpop.eup %3567 }
 0x9ff   :  { %v3570_v12 = vpop.eup %3569  ;;  %v2306_v19 = vmul.f32 %v3568_v5, %v3566_v32 }
 0xa00   :  { %v2305_v20 = vmul.f32 %v3570_v12, %v2303_v14  ;;  %v3572_v28 = vpop.eup %3571 }
 0xa02   :  { %v2307_v24 = vadd.f32 %v2306_v19, %v2305_v20 }
 0xa04   :  { %3573 = vtanh.f32 %v2307_v24 }
 0xa0e   :  { %v3574_v52 = vpop.eup %3573 }
 0xa0f   :  { %v2309_v35 = vmul.f32 %v3574_v52, %v3572_v28 }
 0xa11   :  { %v2314_v41 = vrot.slane %v2309_v35, %v2313_v25 }
 0xa13   :  { %v2315_v49 = vsel %vm2310_vm13, %v2314_v41, %v4187_v31  ;;  %v3416_v31 = vpack.c.bf16 %v2524_v40, %v2523_v11 }
 0xa14   :  { %2818 = vmatmul.mubr.f32.vlgmr.msra.gmra.mrb[20].mxu1 %v2315_v49 }
 0xa15   :  { %3417 = vmatpush3.bf16.msra.mxu0 %v3416_v31 }
 0xa16   :  { %3418 = vmatprep.subr.bf16.mxu0 %v3606_v33 }
 0xa19   :  { %3420 = vmatpush3.bf16.msra.mxu0 %v3419_v2 }
 0xa1a   :  { %3421 = vmatprep.subr.bf16.mxu0 %v3606_v33  ;;  %v3422_v33 = vpack.c.bf16 %v2528_v48, %v2527_v15 }
 0xa1d   :  { %3423 = vmatpush3.bf16.msra.mxu0 %v3422_v33 }
 0xae7   :  { %v2403_v6 = vpop.f32.mrb[20].mxu1 }
 0xae8   :  { %v4298_v53 = vadd.f32 %v2704_v4, %v2403_v6  ;;  %v2819_v59 = vpop.f32.mrb[21].mxu1 }
 0xaea   :  { %v2408_v42 = vmul.f32 1.442695, %v4298_v53 }
 0xaec   :  { %3575 = vpow2.f32 %v2408_v42 }
 0xaf6   :  { %v3576_v44 = vpop.eup %3575 }
 0xaf7   :  { %v2423_v45 = vmul.f32 %v3576_v44, %v2421_v37  ;;  %v2414_v50 = vmul.f32 %v3576_v44, %v2412_v39 }
 0xaf9   :  { %2425 = vrot.lane.b32.xlu1 %v2423_v45, %s3609_s12  ;;  %2416 = vrot.lane.b32.xlu0 %v2414_v50, %s3610_s13 }
 0xafd   :  { %2623 = vrot.lane.b32.xlu0 %v3791_v29, %s3608_s21  ;;  %v2518_v29 = vmax.f32 %v2505_v57, 0.0  ;;  %s3615_s21 = smov 96  }
 0xb01   :  { %2630 = vrot.lane.b32.xlu0 %v4298_v53, %s3611_s14 }
 0xb6b   :  { %v2417_v56 = vpop.permute.xlu0 %2416  ;;  %v2426_v9 = vpop.permute.xlu1 %2425 }
 0xb6c   :  { %v2419_v60 = vadd.f32 %v2417_v56, %v4298_v53  ;;  %v2428_v27 = vadd.f32 %v2426_v9, %v4298_v53 }
 0xb6e   :  { %2626 = vrot.lane.b32.xlu1 %v2419_v60, %s3612_s17  ;;  %2829 = vmatmul.mubr.msk.f32.gmra.mrb[24].mxu0 %vm393_vm4, %v2419_v60 }
 0xb6f   :  { %2847 = vmatprep.mubr.msk.f32.mxu0 %vm3605_vm12, %v3604_v23  ;;  %v2624_v62 = vpop.permute.xlu0 %2623 }
 0xb70   :  { %v2645_v61 = vsel %vm393_vm4, %v3783_v21, %v2624_v62 }
 0xb72   :  { %2848 = vmatmul.mubr.msk.f32.vlgmr.msra.gmra.mrb[26].mxu0 %vm143_vm3, %v2518_v29 }
 0xb73   :  { %2850 = vmatprep.mubr.msk.f32.mxu0 %vm3605_vm12, %v3604_v23  ;;  %v2631_v32 = vpop.permute.xlu0 %2630 }
 0xb76   :  { %2851 = vmatmul.mubr.msk.f32.gmra.mrb[28].mxu0 %vm143_vm3, %v2519_v3 }
 0xb77   :  { %2853 = vmatprep.mubr.msk.f32.mxu0 %vm3605_vm12, %v3604_v23 }
 0xbe0   :  { %v2627_v17 = vpop.permute.xlu1 %2626 }
 0xbe1   :  { %v2646_v18 = vsel %vm46_vm0, %v2645_v61, %v2627_v17 }
 0xbe2   :  { %v2648_v5 = vsel %vm2647_vm14, %v2646_v18, %v2428_v27 }
 0xbe3   :  { %v2650_v19 = vsel %vm2649_vm15, %v2648_v5, %v2631_v32 }
 0xc41   :  { %v2514_v7 = vpop.f32.mrb[24].mxu0 }
 0xc42   :  { %v2515_v10 = vadd.f32 %v2705_v51, %v2514_v7  ;;  %v2830_v13 = vpop.f32.mrb[25].mxu0 }
 0xc44   :  { %v2520_v36 = vmax.f32 %v2515_v10, 0.0 }
 0xc45   :  { %v2609_v38 = vpop.f32.mrb[26].mxu0 }
 0xc46   :  { %v2610_v46 = vadd.f32 %v2709_v16, %v2609_v38  ;;  %v2849_v47 = vpop.f32.mrb[27].mxu0  ;;  %2854 = vmatmul.mubr.msk.f32.gmra.mrb[30].mxu0 %vm143_vm3, %v2520_v36 }
 0xc48   :  { %2634 = vrot.lane.b32.xlu1 %v2610_v46, %s3613_s19 }
 0xc49   :  { %v2614_v54 = vpop.f32.mrb[28].mxu0 }
 0xc4a   :  { %v2615_v55 = vadd.f32 %v2709_v16, %v2614_v54  ;;  %v2852_v0 = vpop.f32.mrb[29].mxu0 }
 0xc4c   :  { %2638 = vrot.lane.b32.xlu0 %v2615_v55, %s3614_s20 }
 0xcba   :  { %v2635_v14 = vpop.permute.xlu1 %2634 }
 0xcbb   :  { %v2651_v30 = vsel %vm143_vm3, %v2650_v19, %v2635_v14 }
 0xcbe   :  { %v2639_v12 = vpop.permute.xlu0 %2638 }
 0xcbf   :  { %v2653_v20 = vsel %vm2652_vm1, %v2651_v30, %v2639_v12 }
 0xd19   :  { %v2619_v23 = vpop.f32.mrb[30].mxu0 }
 0xd1a   :  { %v2620_v1 = vadd.f32 %v2709_v16, %v2619_v23  ;;  %v2855_v8 = vpop.f32.mrb[31].mxu0 }
 0xd1c   :  { %2642 = vrot.lane.b32.xlu1 %v2620_v1, %s3615_s21 }
 0xd8e   :  { %v2643_v24 = vpop.permute.xlu1 %2642 }
 0xd8f   :  { %v2655_v28 = vsel %vm2654_vm2, %v2653_v20, %v2643_v24 }
 0xd90   :  { %v2657_v21 = vsel %vm2656_vm5, %v2655_v28, 0.0 }
 0xd91   :  { %2658 = vst [vmem:[%s4343_s6] sm:$0xff] %v2657_v21 }
 0xd92   :  { %2663 = vsyncpa [#allocation3], 1 }

</bundles_post_ra>
